<compile_context>
chip_gen: v6e
topology: v6e:2x2x1
jax: 0.10.0
libtpu: 0.0.40
codegen_flags: <defaults>
</compile_context>

<pallas_src>
import functools

import jax
import jax.numpy as jnp
from jax import lax
from jax.experimental import pallas as pl
from jax.experimental.pallas import tpu as pltpu


def residual_lstm_kernel(
    x_ref,                 # (T*B, D)     f32
    wih_ref,               # (D, 8D)      bf16  [fwd i,f,o,g | bwd i,f,o,g]
    whh_ref,               # (2D, 4D)     bf16  [whh_fwd ; whh_bwd], gates i,f,o,g
    b_ref,                 # (1, 8D)      f32   [fwd | bwd]
    w1a_ref,               # (D, 4D)      bf16  (acts on forward hidden)
    w1b_ref,               # (D, 4D)      bf16  (acts on backward hidden)
    b1_ref,                # (1, 4D)      f32
    w2_ref,                # (4D, D)      bf16
    b2_ref,                # (1, D)       f32
    out_ref,               # (T*B, D)     f32
    xp_scr,                # (T, 2B, 4D)  bf16: [fwd preact @ t ; bwd preact @ T-1-t]
    of_scr,                # (T, B, D)    bf16: forward hidden states
    ob_scr,                # (T, B, D)    bf16: backward hidden states
    *, T, B, D,
):
    TB = T * B
    D4 = 4 * D

    # ---- 1) combined input projection (one bf16 MXU matmul), pre-arranged ----
    x_bf = x_ref[...].astype(jnp.bfloat16)
    xp = jnp.dot(x_bf, wih_ref[...], preferred_element_type=jnp.float32) + b_ref[...]
    xp_bf = xp.astype(jnp.bfloat16)                        # (TB, 8D)
    # xp_scr[t] = [fwd preact at time t ; bwd preact at time T-1-t]  -> one
    # contiguous (2B, 4D) load per recurrence step.
    # TODO(synk): for large T, fold this rearrangement into a tiled/pipelined phase 1
    #             instead of a static Python loop.
    for t in range(T):
        xp_scr[t, :B, :] = xp_bf[t * B:(t + 1) * B, :D4]          # fwd, natural time
        xp_scr[T - 1 - t, B:, :] = xp_bf[t * B:(t + 1) * B, D4:]  # bwd, reversed time

    # ---- 2) fused fwd+bwd recurrence, state carried in vregs ----
    # h_pad (2B, 2D) bf16: rows [0:B] = [h_fwd | 0], rows [B:2B] = [0 | h_bwd].
    # whh_ref = [whh_fwd ; whh_bwd] (2D, 4D), so h_pad @ whh gives every row its own
    # direction's recurrent contribution directly (result only (2B, 4D) wide).
    row_is_fwd = lax.broadcasted_iota(jnp.int32, (2 * B, 1), 0) < B

    def step(t, carry):
        h_pad, c = carry                                   # (2B,2D) bf16, (2B,D) f32
        pre = (jnp.dot(h_pad, whh_ref[...], preferred_element_type=jnp.float32)
               + xp_scr[t].astype(jnp.float32))            # (2B, 4D) f32
        # Gate order (i, f, o, g): one sigmoid over 3D lanes, one tanh over D lanes.
        sig = jax.nn.sigmoid(pre[:, :3 * D])
        g = jnp.tanh(pre[:, 3 * D:])
        c_new = sig[:, D:2 * D] * c + sig[:, :D] * g       # (2B, D) f32
        h_new = sig[:, 2 * D:] * jnp.tanh(c_new)           # (2B, D) f32
        h_bf = h_new.astype(jnp.bfloat16)
        of_scr[t] = h_bf[:B]                               # fwd hidden at time t
        ob_scr[T - 1 - t] = h_bf[B:]                       # bwd hidden at time T-1-t
        zero = jnp.zeros_like(h_bf)
        h_pad_new = jnp.concatenate(
            [jnp.where(row_is_fwd, h_bf, zero),
             jnp.where(row_is_fwd, zero, h_bf)], axis=1)   # (2B, 2D) bf16
        return h_pad_new, c_new

    h0 = jnp.zeros((2 * B, 2 * D), jnp.bfloat16)
    c0 = jnp.zeros((2 * B, D), jnp.float32)
    unroll = T if T <= 16 else 4
    lax.fori_loop(0, T, step, (h0, c0), unroll=unroll)

    # ---- 3) MLP head (split W1 -> no fwd/bwd concatenate) + residual ----
    lo_f = of_scr[...].reshape(TB, D)                      # bf16
    lo_b = ob_scr[...].reshape(TB, D)                      # bf16
    hid = jnp.maximum(
        jnp.dot(lo_f, w1a_ref[...], preferred_element_type=jnp.float32)
        + jnp.dot(lo_b, w1b_ref[...], preferred_element_type=jnp.float32)
        + b1_ref[...],
        0.0)
    y = (jnp.dot(hid.astype(jnp.bfloat16), w2_ref[...],
                 preferred_element_type=jnp.float32) + b2_ref[...])
    out_ref[...] = x_ref[...] + y


def _reorder_gates(w, D):
    """PyTorch gate blocks [i, f, g, o] along axis 0 -> [i, f, o, g]."""
    return jnp.concatenate([w[0 * D:2 * D], w[3 * D:4 * D], w[2 * D:3 * D]], axis=0)


def prepare_kernel_params(p, D):
    """Convert PyTorch-layout weights into the fused/pre-transposed kernel layout."""
    def direction(w_ih, w_hh, b_ih, b_hh):
        wih = _reorder_gates(w_ih, D).T            # (D, 4D)
        whh = _reorder_gates(w_hh, D).T            # (D, 4D)
        b = _reorder_gates(b_ih + b_hh, D)         # (4D,)
        return wih, whh, b

    wih_f, whh_f, b_f = direction(p["w_ih_f"], p["w_hh_f"], p["b_ih_f"], p["b_hh_f"])
    wih_b, whh_b, b_b = direction(p["w_ih_b"], p["w_hh_b"], p["b_ih_b"], p["b_hh_b"])
    w1t = p["w1"].T                                # (2D, 4D)
    return dict(
        wih=jnp.concatenate([wih_f, wih_b], axis=1).astype(jnp.bfloat16),  # (D, 8D)
        whh=jnp.concatenate([whh_f, whh_b], axis=0).astype(jnp.bfloat16),  # (2D, 4D)
        b=jnp.concatenate([b_f, b_b])[None, :].astype(jnp.float32),        # (1, 8D)
        w1a=w1t[:D].astype(jnp.bfloat16),                                  # (D, 4D)
        w1b=w1t[D:].astype(jnp.bfloat16),                                  # (D, 4D)
        b1=p["b1"][None, :].astype(jnp.float32),                           # (1, 4D)
        w2=p["w2"].T.astype(jnp.bfloat16),                                 # (4D, D)
        b2=p["b2"][None, :].astype(jnp.float32),                           # (1, D)
    )


@jax.jit
def _forward(x, kp):
    T, B, D = x.shape
    TB = T * B
    x2 = x.reshape(TB, D)

    # Right-size the VMEM request from actual resident bytes (+ padding headroom).
    resident = (
        2 * TB * D * 4                                        # x in + out (f32)
        + sum(int(v.size) * v.dtype.itemsize for v in kp.values())
        + T * 2 * B * 4 * D * 2                               # xp_scr  (bf16)
        + 2 * T * B * D * 2                                   # of/ob   (bf16)
    )
    vmem_limit = int(min(100 * 1024 * 1024, max(8 * 1024 * 1024, 4 * resident)))

    vmem = pl.BlockSpec(memory_space=pltpu.MemorySpace.VMEM)
    kernel = functools.partial(residual_lstm_kernel, T=T, B=B, D=D)
    out2 = pl.pallas_call(
        kernel,
        out_shape=jax.ShapeDtypeStruct((TB, D), jnp.float32),
        in_specs=[vmem] * 9,
        out_specs=vmem,
        scratch_shapes=[
            pltpu.VMEM((T, 2 * B, 4 * D), jnp.bfloat16),   # xp_scr (pre-arranged)
            pltpu.VMEM((T, B, D), jnp.bfloat16),           # of_scr
            pltpu.VMEM((T, B, D), jnp.bfloat16),           # ob_scr
        ],
        input_output_aliases={0: 0},                       # reuse x's HBM buffer
        compiler_params=pltpu.CompilerParams(vmem_limit_bytes=vmem_limit),
    )(x2, kp["wih"], kp["whh"], kp["b"],
      kp["w1a"], kp["w1b"], kp["b1"], kp["w2"], kp["b2"])
    return out2.reshape(T, B, D)


def residual_lstm(x, torch_params):
    _, _, D = x.shape
    kp = prepare_kernel_params(torch_params, D)
    return _forward(x, kp)


def make_torch_params(key, D):
    """Deterministic synthetic parameters in PyTorch layout (gate order i,f,g,o)."""
    ks = jax.random.split(key, 12)
    s = 0.1
    n = lambda k, shape: jax.random.normal(k, shape, jnp.float32) * s
    return {
        "w_ih_f": n(ks[0], (4 * D, D)), "w_hh_f": n(ks[1], (4 * D, D)),
        "b_ih_f": n(ks[2], (4 * D,)),   "b_hh_f": n(ks[3], (4 * D,)),
        "w_ih_b": n(ks[4], (4 * D, D)), "w_hh_b": n(ks[5], (4 * D, D)),
        "b_ih_b": n(ks[6], (4 * D,)),   "b_hh_b": n(ks[7], (4 * D,)),
        "w1": n(ks[8], (4 * D, 2 * D)), "b1": n(ks[9], (4 * D,)),
        "w2": n(ks[10], (D, 4 * D)),    "b2": n(ks[11], (D,)),
    }


def reference_forward(x, p):
    """Pure-JAX f32 reference mirroring the PyTorch module exactly."""
    T, B, D = x.shape

    def run_dir(w_ih, w_hh, b_ih, b_hh, reverse):
        xs = x[::-1] if reverse else x

        def step(carry, xt):
            h, c = carry
            pre = xt @ w_ih.T + h @ w_hh.T + b_ih + b_hh
            i = jax.nn.sigmoid(pre[:, :D])
            f = jax.nn.sigmoid(pre[:, D:2 * D])
            g = jnp.tanh(pre[:, 2 * D:3 * D])
            o = jax.nn.sigmoid(pre[:, 3 * D:])
            c = f * c + i * g
            h = o * jnp.tanh(c)
            return (h, c), h

        init = (jnp.zeros((B, D), jnp.float32), jnp.zeros((B, D), jnp.float32))
        _, hs = lax.scan(step, init, xs)
        return hs[::-1] if reverse else hs

    hf = run_dir(p["w_ih_f"], p["w_hh_f"], p["b_ih_f"], p["b_hh_f"], False)
    hb = run_dir(p["w_ih_b"], p["w_hh_b"], p["b_ih_b"], p["b_hh_b"], True)
    lo = jnp.concatenate([hf, hb], axis=-1)
    hid = jnp.maximum(lo @ p["w1"].T + p["b1"], 0.0)
    y = hid @ p["w2"].T + p["b2"]
    return x + y


if __name__ == "__main__":
    T, B, D = 8, 2, 32   # seq=8, batch=2, d_model=32
    key = jax.random.PRNGKey(0)
    kx, kp = jax.random.split(key)
    x = jax.random.normal(kx, (T, B, D), jnp.float32)
    params = make_torch_params(kp, D)

    out = jax.block_until_ready(residual_lstm(x, params))
    ref = jax.block_until_ready(reference_forward(x, params))

    assert out.shape == (T, B, D)
    # Kernel uses bf16 MXU matmuls / bf16 state & scratches (f32 accumulation);
    # compare against the pure f32 reference.
    err = jnp.max(jnp.abs(out - ref))
    assert jnp.allclose(out, ref, rtol=3e-2, atol=3e-2), f"mismatch, max abs err={err}"
    print("KERNEL_OK")
</pallas_src>

<mosaic_0001>
module attributes {stable_mosaic.version = 11 : i64} {
  func.func @residual_lstm_kernel(%arg0: memref<16x32xf32, #tpu.memory_space<vmem>>, %arg1: memref<32x256xbf16, #tpu.memory_space<vmem>>, %arg2: memref<64x128xbf16, #tpu.memory_space<vmem>>, %arg3: memref<1x256xf32, #tpu.memory_space<vmem>>, %arg4: memref<32x128xbf16, #tpu.memory_space<vmem>>, %arg5: memref<32x128xbf16, #tpu.memory_space<vmem>>, %arg6: memref<1x128xf32, #tpu.memory_space<vmem>>, %arg7: memref<128x32xbf16, #tpu.memory_space<vmem>>, %arg8: memref<1x32xf32, #tpu.memory_space<vmem>>, %arg9: memref<16x32xf32, #tpu.memory_space<vmem>>, %arg10: memref<8x4x128xbf16, #tpu.memory_space<vmem>>, %arg11: memref<8x2x32xbf16, #tpu.memory_space<vmem>>, %arg12: memref<8x2x32xbf16, #tpu.memory_space<vmem>>) attributes {dimension_semantics = [], scalar_prefetch = 0 : i64, scratch_operands = 3 : i64, tpu.core_type = #tpu.core_type<tc>} {
    %c0 = arith.constant 0 : index
    %c0_0 = arith.constant 0 : index
    %0 = vector.load %arg0[%c0, %c0_0] : memref<16x32xf32, #tpu.memory_space<vmem>>, vector<16x32xf32>
    %1 = arith.truncf %0 : vector<16x32xf32> to vector<16x32xbf16>
    %c0_1 = arith.constant 0 : index
    %c0_2 = arith.constant 0 : index
    %2 = vector.load %arg1[%c0_1, %c0_2] : memref<32x256xbf16, #tpu.memory_space<vmem>>, vector<32x256xbf16>
    %cst = arith.constant dense<0.000000e+00> : vector<16x256xf32>
    %3 = tpu.matmul %1, %2, %cst {dimension_numbers = #tpu.dot_dimension_numbers<[1], [0], [0], [1], [0, 0, 1, 1], [], []>} : vector<16x32xbf16>, vector<32x256xbf16>, vector<16x256xf32> -> vector<16x256xf32>
    %c0_3 = arith.constant 0 : index
    %c0_4 = arith.constant 0 : index
    %4 = vector.load %arg3[%c0_3, %c0_4] : memref<1x256xf32, #tpu.memory_space<vmem>>, vector<1x256xf32>
    %5 = vector.broadcast %4 : vector<1x256xf32> to vector<16x256xf32>
    %6 = arith.addf %3, %5 : vector<16x256xf32>
    %7 = arith.truncf %6 : vector<16x256xf32> to vector<16x256xbf16>
    %8 = vector.extract_strided_slice %7 {offsets = [0, 0], sizes = [2, 128], strides = [1, 1]} : vector<16x256xbf16> to vector<2x128xbf16>
    %c0_5 = arith.constant 0 : index
    %c0_6 = arith.constant 0 : index
    %c0_7 = arith.constant 0 : index
    %9 = vector.load %arg10[%c0_5, %c0_6, %c0_7] : memref<8x4x128xbf16, #tpu.memory_space<vmem>>, vector<1x2x128xbf16>
    %10 = vector.shape_cast %9 : vector<1x2x128xbf16> to vector<2x128xbf16>
    %11 = vector.shape_cast %8 : vector<2x128xbf16> to vector<1x2x128xbf16>
    tpu.vector_store %arg10[%c0_5, %c0_6, %c0_7], %11 {strides = array<i32>} : memref<8x4x128xbf16, #tpu.memory_space<vmem>>, vector<1x2x128xbf16>,
    %12 = vector.extract_strided_slice %7 {offsets = [0, 128], sizes = [2, 128], strides = [1, 1]} : vector<16x256xbf16> to vector<2x128xbf16>
    %c7 = arith.constant 7 : index
    %c2 = arith.constant 2 : index
    %c0_8 = arith.constant 0 : index
    %13 = vector.load %arg10[%c7, %c2, %c0_8] : memref<8x4x128xbf16, #tpu.memory_space<vmem>>, vector<1x2x128xbf16>
    %14 = vector.shape_cast %13 : vector<1x2x128xbf16> to vector<2x128xbf16>
    %15 = vector.shape_cast %12 : vector<2x128xbf16> to vector<1x2x128xbf16>
    tpu.vector_store %arg10[%c7, %c2, %c0_8], %15 {strides = array<i32>} : memref<8x4x128xbf16, #tpu.memory_space<vmem>>, vector<1x2x128xbf16>,
    %16 = vector.extract_strided_slice %7 {offsets = [2, 0], sizes = [2, 128], strides = [1, 1]} : vector<16x256xbf16> to vector<2x128xbf16>
    %c1 = arith.constant 1 : index
    %c0_9 = arith.constant 0 : index
    %c0_10 = arith.constant 0 : index
    %17 = vector.load %arg10[%c1, %c0_9, %c0_10] : memref<8x4x128xbf16, #tpu.memory_space<vmem>>, vector<1x2x128xbf16>
    %18 = vector.shape_cast %17 : vector<1x2x128xbf16> to vector<2x128xbf16>
    %19 = vector.shape_cast %16 : vector<2x128xbf16> to vector<1x2x128xbf16>
    tpu.vector_store %arg10[%c1, %c0_9, %c0_10], %19 {strides = array<i32>} : memref<8x4x128xbf16, #tpu.memory_space<vmem>>, vector<1x2x128xbf16>,
    %20 = vector.extract_strided_slice %7 {offsets = [2, 128], sizes = [2, 128], strides = [1, 1]} : vector<16x256xbf16> to vector<2x128xbf16>
    %c6 = arith.constant 6 : index
    %c2_11 = arith.constant 2 : index
    %c0_12 = arith.constant 0 : index
    %21 = vector.load %arg10[%c6, %c2_11, %c0_12] : memref<8x4x128xbf16, #tpu.memory_space<vmem>>, vector<1x2x128xbf16>
    %22 = vector.shape_cast %21 : vector<1x2x128xbf16> to vector<2x128xbf16>
    %23 = vector.shape_cast %20 : vector<2x128xbf16> to vector<1x2x128xbf16>
    tpu.vector_store %arg10[%c6, %c2_11, %c0_12], %23 {strides = array<i32>} : memref<8x4x128xbf16, #tpu.memory_space<vmem>>, vector<1x2x128xbf16>,
    %24 = vector.extract_strided_slice %7 {offsets = [4, 0], sizes = [2, 128], strides = [1, 1]} : vector<16x256xbf16> to vector<2x128xbf16>
    %c2_13 = arith.constant 2 : index
    %c0_14 = arith.constant 0 : index
    %c0_15 = arith.constant 0 : index
    %25 = vector.load %arg10[%c2_13, %c0_14, %c0_15] : memref<8x4x128xbf16, #tpu.memory_space<vmem>>, vector<1x2x128xbf16>
    %26 = vector.shape_cast %25 : vector<1x2x128xbf16> to vector<2x128xbf16>
    %27 = vector.shape_cast %24 : vector<2x128xbf16> to vector<1x2x128xbf16>
    tpu.vector_store %arg10[%c2_13, %c0_14, %c0_15], %27 {strides = array<i32>} : memref<8x4x128xbf16, #tpu.memory_space<vmem>>, vector<1x2x128xbf16>,
    %28 = vector.extract_strided_slice %7 {offsets = [4, 128], sizes = [2, 128], strides = [1, 1]} : vector<16x256xbf16> to vector<2x128xbf16>
    %c5 = arith.constant 5 : index
    %c2_16 = arith.constant 2 : index
    %c0_17 = arith.constant 0 : index
    %29 = vector.load %arg10[%c5, %c2_16, %c0_17] : memref<8x4x128xbf16, #tpu.memory_space<vmem>>, vector<1x2x128xbf16>
    %30 = vector.shape_cast %29 : vector<1x2x128xbf16> to vector<2x128xbf16>
    %31 = vector.shape_cast %28 : vector<2x128xbf16> to vector<1x2x128xbf16>
    tpu.vector_store %arg10[%c5, %c2_16, %c0_17], %31 {strides = array<i32>} : memref<8x4x128xbf16, #tpu.memory_space<vmem>>, vector<1x2x128xbf16>,
    %32 = vector.extract_strided_slice %7 {offsets = [6, 0], sizes = [2, 128], strides = [1, 1]} : vector<16x256xbf16> to vector<2x128xbf16>
    %c3 = arith.constant 3 : index
    %c0_18 = arith.constant 0 : index
    %c0_19 = arith.constant 0 : index
    %33 = vector.load %arg10[%c3, %c0_18, %c0_19] : memref<8x4x128xbf16, #tpu.memory_space<vmem>>, vector<1x2x128xbf16>
    %34 = vector.shape_cast %33 : vector<1x2x128xbf16> to vector<2x128xbf16>
    %35 = vector.shape_cast %32 : vector<2x128xbf16> to vector<1x2x128xbf16>
    tpu.vector_store %arg10[%c3, %c0_18, %c0_19], %35 {strides = array<i32>} : memref<8x4x128xbf16, #tpu.memory_space<vmem>>, vector<1x2x128xbf16>,
    %36 = vector.extract_strided_slice %7 {offsets = [6, 128], sizes = [2, 128], strides = [1, 1]} : vector<16x256xbf16> to vector<2x128xbf16>
    %c4 = arith.constant 4 : index
    %c2_20 = arith.constant 2 : index
    %c0_21 = arith.constant 0 : index
    %37 = vector.load %arg10[%c4, %c2_20, %c0_21] : memref<8x4x128xbf16, #tpu.memory_space<vmem>>, vector<1x2x128xbf16>
    %38 = vector.shape_cast %37 : vector<1x2x128xbf16> to vector<2x128xbf16>
    %39 = vector.shape_cast %36 : vector<2x128xbf16> to vector<1x2x128xbf16>
    tpu.vector_store %arg10[%c4, %c2_20, %c0_21], %39 {strides = array<i32>} : memref<8x4x128xbf16, #tpu.memory_space<vmem>>, vector<1x2x128xbf16>,
    %40 = vector.extract_strided_slice %7 {offsets = [8, 0], sizes = [2, 128], strides = [1, 1]} : vector<16x256xbf16> to vector<2x128xbf16>
    %c4_22 = arith.constant 4 : index
    %c0_23 = arith.constant 0 : index
    %c0_24 = arith.constant 0 : index
    %41 = vector.load %arg10[%c4_22, %c0_23, %c0_24] : memref<8x4x128xbf16, #tpu.memory_space<vmem>>, vector<1x2x128xbf16>
    %42 = vector.shape_cast %41 : vector<1x2x128xbf16> to vector<2x128xbf16>
    %43 = vector.shape_cast %40 : vector<2x128xbf16> to vector<1x2x128xbf16>
    tpu.vector_store %arg10[%c4_22, %c0_23, %c0_24], %43 {strides = array<i32>} : memref<8x4x128xbf16, #tpu.memory_space<vmem>>, vector<1x2x128xbf16>,
    %44 = vector.extract_strided_slice %7 {offsets = [8, 128], sizes = [2, 128], strides = [1, 1]} : vector<16x256xbf16> to vector<2x128xbf16>
    %c3_25 = arith.constant 3 : index
    %c2_26 = arith.constant 2 : index
    %c0_27 = arith.constant 0 : index
    %45 = vector.load %arg10[%c3_25, %c2_26, %c0_27] : memref<8x4x128xbf16, #tpu.memory_space<vmem>>, vector<1x2x128xbf16>
    %46 = vector.shape_cast %45 : vector<1x2x128xbf16> to vector<2x128xbf16>
    %47 = vector.shape_cast %44 : vector<2x128xbf16> to vector<1x2x128xbf16>
    tpu.vector_store %arg10[%c3_25, %c2_26, %c0_27], %47 {strides = array<i32>} : memref<8x4x128xbf16, #tpu.memory_space<vmem>>, vector<1x2x128xbf16>,
    %48 = vector.extract_strided_slice %7 {offsets = [10, 0], sizes = [2, 128], strides = [1, 1]} : vector<16x256xbf16> to vector<2x128xbf16>
    %c5_28 = arith.constant 5 : index
    %c0_29 = arith.constant 0 : index
    %c0_30 = arith.constant 0 : index
    %49 = vector.load %arg10[%c5_28, %c0_29, %c0_30] : memref<8x4x128xbf16, #tpu.memory_space<vmem>>, vector<1x2x128xbf16>
    %50 = vector.shape_cast %49 : vector<1x2x128xbf16> to vector<2x128xbf16>
    %51 = vector.shape_cast %48 : vector<2x128xbf16> to vector<1x2x128xbf16>
    tpu.vector_store %arg10[%c5_28, %c0_29, %c0_30], %51 {strides = array<i32>} : memref<8x4x128xbf16, #tpu.memory_space<vmem>>, vector<1x2x128xbf16>,
    %52 = vector.extract_strided_slice %7 {offsets = [10, 128], sizes = [2, 128], strides = [1, 1]} : vector<16x256xbf16> to vector<2x128xbf16>
    %c2_31 = arith.constant 2 : index
    %c2_32 = arith.constant 2 : index
    %c0_33 = arith.constant 0 : index
    %53 = vector.load %arg10[%c2_31, %c2_32, %c0_33] : memref<8x4x128xbf16, #tpu.memory_space<vmem>>, vector<1x2x128xbf16>
    %54 = vector.shape_cast %53 : vector<1x2x128xbf16> to vector<2x128xbf16>
    %55 = vector.shape_cast %52 : vector<2x128xbf16> to vector<1x2x128xbf16>
    tpu.vector_store %arg10[%c2_31, %c2_32, %c0_33], %55 {strides = array<i32>} : memref<8x4x128xbf16, #tpu.memory_space<vmem>>, vector<1x2x128xbf16>,
    %56 = vector.extract_strided_slice %7 {offsets = [12, 0], sizes = [2, 128], strides = [1, 1]} : vector<16x256xbf16> to vector<2x128xbf16>
    %c6_34 = arith.constant 6 : index
    %c0_35 = arith.constant 0 : index
    %c0_36 = arith.constant 0 : index
    %57 = vector.load %arg10[%c6_34, %c0_35, %c0_36] : memref<8x4x128xbf16, #tpu.memory_space<vmem>>, vector<1x2x128xbf16>
    %58 = vector.shape_cast %57 : vector<1x2x128xbf16> to vector<2x128xbf16>
    %59 = vector.shape_cast %56 : vector<2x128xbf16> to vector<1x2x128xbf16>
    tpu.vector_store %arg10[%c6_34, %c0_35, %c0_36], %59 {strides = array<i32>} : memref<8x4x128xbf16, #tpu.memory_space<vmem>>, vector<1x2x128xbf16>,
    %60 = vector.extract_strided_slice %7 {offsets = [12, 128], sizes = [2, 128], strides = [1, 1]} : vector<16x256xbf16> to vector<2x128xbf16>
    %c1_37 = arith.constant 1 : index
    %c2_38 = arith.constant 2 : index
    %c0_39 = arith.constant 0 : index
    %61 = vector.load %arg10[%c1_37, %c2_38, %c0_39] : memref<8x4x128xbf16, #tpu.memory_space<vmem>>, vector<1x2x128xbf16>
    %62 = vector.shape_cast %61 : vector<1x2x128xbf16> to vector<2x128xbf16>
    %63 = vector.shape_cast %60 : vector<2x128xbf16> to vector<1x2x128xbf16>
    tpu.vector_store %arg10[%c1_37, %c2_38, %c0_39], %63 {strides = array<i32>} : memref<8x4x128xbf16, #tpu.memory_space<vmem>>, vector<1x2x128xbf16>,
    %64 = vector.extract_strided_slice %7 {offsets = [14, 0], sizes = [2, 128], strides = [1, 1]} : vector<16x256xbf16> to vector<2x128xbf16>
    %c7_40 = arith.constant 7 : index
    %c0_41 = arith.constant 0 : index
    %c0_42 = arith.constant 0 : index
    %65 = vector.load %arg10[%c7_40, %c0_41, %c0_42] : memref<8x4x128xbf16, #tpu.memory_space<vmem>>, vector<1x2x128xbf16>
    %66 = vector.shape_cast %65 : vector<1x2x128xbf16> to vector<2x128xbf16>
    %67 = vector.shape_cast %64 : vector<2x128xbf16> to vector<1x2x128xbf16>
    tpu.vector_store %arg10[%c7_40, %c0_41, %c0_42], %67 {strides = array<i32>} : memref<8x4x128xbf16, #tpu.memory_space<vmem>>, vector<1x2x128xbf16>,
    %68 = vector.extract_strided_slice %7 {offsets = [14, 128], sizes = [2, 128], strides = [1, 1]} : vector<16x256xbf16> to vector<2x128xbf16>
    %c0_43 = arith.constant 0 : index
    %c2_44 = arith.constant 2 : index
    %c0_45 = arith.constant 0 : index
    %69 = vector.load %arg10[%c0_43, %c2_44, %c0_45] : memref<8x4x128xbf16, #tpu.memory_space<vmem>>, vector<1x2x128xbf16>
    %70 = vector.shape_cast %69 : vector<1x2x128xbf16> to vector<2x128xbf16>
    %71 = vector.shape_cast %68 : vector<2x128xbf16> to vector<1x2x128xbf16>
    tpu.vector_store %arg10[%c0_43, %c2_44, %c0_45], %71 {strides = array<i32>} : memref<8x4x128xbf16, #tpu.memory_space<vmem>>, vector<1x2x128xbf16>,
    %72 = tpu.iota {dimensions = array<i32: 0>} : vector<4x1xi32>
    %c2_i32 = arith.constant 2 : i32
    %73 = vector.broadcast %c2_i32 : i32 to vector<4x1xi32>
    %74 = arith.cmpi slt, %72, %73 : vector<4x1xi32>
    %cst_46 = arith.constant 0.000000e+00 : bf16
    %75 = vector.broadcast %cst_46 : bf16 to vector<4x64xbf16>
    %cst_47 = arith.constant 0.000000e+00 : f32
    %76 = vector.broadcast %cst_47 : f32 to vector<4x32xf32>
    %c0_i32 = arith.constant 0 : i32
    %c0_48 = arith.constant 0 : index
    %c0_49 = arith.constant 0 : index
    %77 = vector.load %arg2[%c0_48, %c0_49] : memref<64x128xbf16, #tpu.memory_space<vmem>>, vector<64x128xbf16>
    %cst_50 = arith.constant dense<0.000000e+00> : vector<4x128xf32>
    %78 = tpu.matmul %75, %77, %cst_50 {dimension_numbers = #tpu.dot_dimension_numbers<[1], [0], [0], [1], [0, 0, 1, 1], [], []>} : vector<4x64xbf16>, vector<64x128xbf16>, vector<4x128xf32> -> vector<4x128xf32>
    %79 = arith.index_cast %c0_i32 : i32 to index
    %c0_51 = arith.constant 0 : index
    %c0_52 = arith.constant 0 : index
    %80 = vector.load %arg10[%79, %c0_51, %c0_52] : memref<8x4x128xbf16, #tpu.memory_space<vmem>>, vector<1x4x128xbf16>
    %81 = vector.shape_cast %80 : vector<1x4x128xbf16> to vector<4x128xbf16>
    %82 = arith.extf %81 : vector<4x128xbf16> to vector<4x128xf32>
    %83 = arith.addf %78, %82 : vector<4x128xf32>
    %84 = vector.extract_strided_slice %83 {offsets = [0, 0], sizes = [4, 96], strides = [1, 1]} : vector<4x128xf32> to vector<4x96xf32>
    %85 = arith.negf %84 : vector<4x96xf32>
    %86 = math.exp %85 : vector<4x96xf32>
    %cst_53 = arith.constant 1.000000e+00 : f32
    %87 = vector.broadcast %cst_53 : f32 to vector<4x96xf32>
    %88 = arith.addf %87, %86 : vector<4x96xf32>
    %89 = arith.divf %87, %88 : vector<4x96xf32>
    %90 = vector.extract_strided_slice %83 {offsets = [0, 96], sizes = [4, 32], strides = [1, 1]} : vector<4x128xf32> to vector<4x32xf32>
    %91 = math.tanh %90 : vector<4x32xf32>
    %92 = vector.extract_strided_slice %89 {offsets = [0, 32], sizes = [4, 32], strides = [1, 1]} : vector<4x96xf32> to vector<4x32xf32>
    %93 = arith.mulf %92, %76 : vector<4x32xf32>
    %94 = vector.extract_strided_slice %89 {offsets = [0, 0], sizes = [4, 32], strides = [1, 1]} : vector<4x96xf32> to vector<4x32xf32>
    %95 = arith.mulf %94, %91 : vector<4x32xf32>
    %96 = arith.addf %93, %95 : vector<4x32xf32>
    %97 = vector.extract_strided_slice %89 {offsets = [0, 64], sizes = [4, 32], strides = [1, 1]} : vector<4x96xf32> to vector<4x32xf32>
    %98 = math.tanh %96 : vector<4x32xf32>
    %99 = arith.mulf %97, %98 : vector<4x32xf32>
    %100 = arith.truncf %99 : vector<4x32xf32> to vector<4x32xbf16>
    %101 = vector.extract_strided_slice %100 {offsets = [0, 0], sizes = [2, 32], strides = [1, 1]} : vector<4x32xbf16> to vector<2x32xbf16>
    %102 = arith.index_cast %c0_i32 : i32 to index
    %c0_54 = arith.constant 0 : index
    %c0_55 = arith.constant 0 : index
    %103 = vector.load %arg11[%102, %c0_54, %c0_55] : memref<8x2x32xbf16, #tpu.memory_space<vmem>>, vector<1x2x32xbf16>
    %104 = vector.shape_cast %103 : vector<1x2x32xbf16> to vector<2x32xbf16>
    %105 = vector.shape_cast %101 : vector<2x32xbf16> to vector<1x2x32xbf16>
    tpu.vector_store %arg11[%102, %c0_54, %c0_55], %105 {strides = array<i32>} : memref<8x2x32xbf16, #tpu.memory_space<vmem>>, vector<1x2x32xbf16>,
    %106 = vector.extract_strided_slice %100 {offsets = [2, 0], sizes = [2, 32], strides = [1, 1]} : vector<4x32xbf16> to vector<2x32xbf16>
    %c7_i32 = arith.constant 7 : i32
    %107 = arith.subi %c7_i32, %c0_i32 : i32
    %108 = arith.index_cast %107 : i32 to index
    %c0_56 = arith.constant 0 : index
    %c0_57 = arith.constant 0 : index
    %109 = vector.load %arg12[%108, %c0_56, %c0_57] : memref<8x2x32xbf16, #tpu.memory_space<vmem>>, vector<1x2x32xbf16>
    %110 = vector.shape_cast %109 : vector<1x2x32xbf16> to vector<2x32xbf16>
    %111 = vector.shape_cast %106 : vector<2x32xbf16> to vector<1x2x32xbf16>
    tpu.vector_store %arg12[%108, %c0_56, %c0_57], %111 {strides = array<i32>} : memref<8x2x32xbf16, #tpu.memory_space<vmem>>, vector<1x2x32xbf16>,
    %cst_58 = arith.constant 0.000000e+00 : bf16
    %112 = vector.broadcast %cst_58 : bf16 to vector<4x32xbf16>
    %113 = vector.shape_cast %74 : vector<4x1xi1> to vector<4x1xi1>
    %114 = vector.broadcast %113 : vector<4x1xi1> to vector<4x32xi1>
    %115 = arith.select %114, %100, %112 : vector<4x32xi1>, vector<4x32xbf16>
    %116 = vector.shape_cast %74 : vector<4x1xi1> to vector<4x1xi1>
    %117 = vector.broadcast %116 : vector<4x1xi1> to vector<4x32xi1>
    %118 = arith.select %117, %112, %100 : vector<4x32xi1>, vector<4x32xbf16>
    %119 = tpu.concatenate %115, %118 in 1 : vector<4x32xbf16>, vector<4x32xbf16> -> vector<4x64xbf16>
    %c1_i32 = arith.constant 1 : i32
    %c0_59 = arith.constant 0 : index
    %c0_60 = arith.constant 0 : index
    %120 = vector.load %arg2[%c0_59, %c0_60] : memref<64x128xbf16, #tpu.memory_space<vmem>>, vector<64x128xbf16>
    %cst_61 = arith.constant dense<0.000000e+00> : vector<4x128xf32>
    %121 = tpu.matmul %119, %120, %cst_61 {dimension_numbers = #tpu.dot_dimension_numbers<[1], [0], [0], [1], [0, 0, 1, 1], [], []>} : vector<4x64xbf16>, vector<64x128xbf16>, vector<4x128xf32> -> vector<4x128xf32>
    %122 = arith.index_cast %c1_i32 : i32 to index
    %c0_62 = arith.constant 0 : index
    %c0_63 = arith.constant 0 : index
    %123 = vector.load %arg10[%122, %c0_62, %c0_63] : memref<8x4x128xbf16, #tpu.memory_space<vmem>>, vector<1x4x128xbf16>
    %124 = vector.shape_cast %123 : vector<1x4x128xbf16> to vector<4x128xbf16>
    %125 = arith.extf %124 : vector<4x128xbf16> to vector<4x128xf32>
    %126 = arith.addf %121, %125 : vector<4x128xf32>
    %127 = vector.extract_strided_slice %126 {offsets = [0, 0], sizes = [4, 96], strides = [1, 1]} : vector<4x128xf32> to vector<4x96xf32>
    %128 = arith.negf %127 : vector<4x96xf32>
    %129 = math.exp %128 : vector<4x96xf32>
    %cst_64 = arith.constant 1.000000e+00 : f32
    %130 = vector.broadcast %cst_64 : f32 to vector<4x96xf32>
    %131 = arith.addf %130, %129 : vector<4x96xf32>
    %132 = arith.divf %130, %131 : vector<4x96xf32>
    %133 = vector.extract_strided_slice %126 {offsets = [0, 96], sizes = [4, 32], strides = [1, 1]} : vector<4x128xf32> to vector<4x32xf32>
    %134 = math.tanh %133 : vector<4x32xf32>
    %135 = vector.extract_strided_slice %132 {offsets = [0, 32], sizes = [4, 32], strides = [1, 1]} : vector<4x96xf32> to vector<4x32xf32>
    %136 = arith.mulf %135, %96 : vector<4x32xf32>
    %137 = vector.extract_strided_slice %132 {offsets = [0, 0], sizes = [4, 32], strides = [1, 1]} : vector<4x96xf32> to vector<4x32xf32>
    %138 = arith.mulf %137, %134 : vector<4x32xf32>
    %139 = arith.addf %136, %138 : vector<4x32xf32>
    %140 = vector.extract_strided_slice %132 {offsets = [0, 64], sizes = [4, 32], strides = [1, 1]} : vector<4x96xf32> to vector<4x32xf32>
    %141 = math.tanh %139 : vector<4x32xf32>
    %142 = arith.mulf %140, %141 : vector<4x32xf32>
    %143 = arith.truncf %142 : vector<4x32xf32> to vector<4x32xbf16>
    %144 = vector.extract_strided_slice %143 {offsets = [0, 0], sizes = [2, 32], strides = [1, 1]} : vector<4x32xbf16> to vector<2x32xbf16>
    %145 = arith.index_cast %c1_i32 : i32 to index
    %c0_65 = arith.constant 0 : index
    %c0_66 = arith.constant 0 : index
    %146 = vector.load %arg11[%145, %c0_65, %c0_66] : memref<8x2x32xbf16, #tpu.memory_space<vmem>>, vector<1x2x32xbf16>
    %147 = vector.shape_cast %146 : vector<1x2x32xbf16> to vector<2x32xbf16>
    %148 = vector.shape_cast %144 : vector<2x32xbf16> to vector<1x2x32xbf16>
    tpu.vector_store %arg11[%145, %c0_65, %c0_66], %148 {strides = array<i32>} : memref<8x2x32xbf16, #tpu.memory_space<vmem>>, vector<1x2x32xbf16>,
    %149 = vector.extract_strided_slice %143 {offsets = [2, 0], sizes = [2, 32], strides = [1, 1]} : vector<4x32xbf16> to vector<2x32xbf16>
    %c7_i32_67 = arith.constant 7 : i32
    %150 = arith.subi %c7_i32_67, %c1_i32 : i32
    %151 = arith.index_cast %150 : i32 to index
    %c0_68 = arith.constant 0 : index
    %c0_69 = arith.constant 0 : index
    %152 = vector.load %arg12[%151, %c0_68, %c0_69] : memref<8x2x32xbf16, #tpu.memory_space<vmem>>, vector<1x2x32xbf16>
    %153 = vector.shape_cast %152 : vector<1x2x32xbf16> to vector<2x32xbf16>
    %154 = vector.shape_cast %149 : vector<2x32xbf16> to vector<1x2x32xbf16>
    tpu.vector_store %arg12[%151, %c0_68, %c0_69], %154 {strides = array<i32>} : memref<8x2x32xbf16, #tpu.memory_space<vmem>>, vector<1x2x32xbf16>,
    %cst_70 = arith.constant 0.000000e+00 : bf16
    %155 = vector.broadcast %cst_70 : bf16 to vector<4x32xbf16>
    %156 = vector.shape_cast %74 : vector<4x1xi1> to vector<4x1xi1>
    %157 = vector.broadcast %156 : vector<4x1xi1> to vector<4x32xi1>
    %158 = arith.select %157, %143, %155 : vector<4x32xi1>, vector<4x32xbf16>
    %159 = vector.shape_cast %74 : vector<4x1xi1> to vector<4x1xi1>
    %160 = vector.broadcast %159 : vector<4x1xi1> to vector<4x32xi1>
    %161 = arith.select %160, %155, %143 : vector<4x32xi1>, vector<4x32xbf16>
    %162 = tpu.concatenate %158, %161 in 1 : vector<4x32xbf16>, vector<4x32xbf16> -> vector<4x64xbf16>
    %c2_i32_71 = arith.constant 2 : i32
    %c0_72 = arith.constant 0 : index
    %c0_73 = arith.constant 0 : index
    %163 = vector.load %arg2[%c0_72, %c0_73] : memref<64x128xbf16, #tpu.memory_space<vmem>>, vector<64x128xbf16>
    %cst_74 = arith.constant dense<0.000000e+00> : vector<4x128xf32>
    %164 = tpu.matmul %162, %163, %cst_74 {dimension_numbers = #tpu.dot_dimension_numbers<[1], [0], [0], [1], [0, 0, 1, 1], [], []>} : vector<4x64xbf16>, vector<64x128xbf16>, vector<4x128xf32> -> vector<4x128xf32>
    %165 = arith.index_cast %c2_i32_71 : i32 to index
    %c0_75 = arith.constant 0 : index
    %c0_76 = arith.constant 0 : index
    %166 = vector.load %arg10[%165, %c0_75, %c0_76] : memref<8x4x128xbf16, #tpu.memory_space<vmem>>, vector<1x4x128xbf16>
    %167 = vector.shape_cast %166 : vector<1x4x128xbf16> to vector<4x128xbf16>
    %168 = arith.extf %167 : vector<4x128xbf16> to vector<4x128xf32>
    %169 = arith.addf %164, %168 : vector<4x128xf32>
    %170 = vector.extract_strided_slice %169 {offsets = [0, 0], sizes = [4, 96], strides = [1, 1]} : vector<4x128xf32> to vector<4x96xf32>
    %171 = arith.negf %170 : vector<4x96xf32>
    %172 = math.exp %171 : vector<4x96xf32>
    %cst_77 = arith.constant 1.000000e+00 : f32
    %173 = vector.broadcast %cst_77 : f32 to vector<4x96xf32>
    %174 = arith.addf %173, %172 : vector<4x96xf32>
    %175 = arith.divf %173, %174 : vector<4x96xf32>
    %176 = vector.extract_strided_slice %169 {offsets = [0, 96], sizes = [4, 32], strides = [1, 1]} : vector<4x128xf32> to vector<4x32xf32>
    %177 = math.tanh %176 : vector<4x32xf32>
    %178 = vector.extract_strided_slice %175 {offsets = [0, 32], sizes = [4, 32], strides = [1, 1]} : vector<4x96xf32> to vector<4x32xf32>
    %179 = arith.mulf %178, %139 : vector<4x32xf32>
    %180 = vector.extract_strided_slice %175 {offsets = [0, 0], sizes = [4, 32], strides = [1, 1]} : vector<4x96xf32> to vector<4x32xf32>
    %181 = arith.mulf %180, %177 : vector<4x32xf32>
    %182 = arith.addf %179, %181 : vector<4x32xf32>
    %183 = vector.extract_strided_slice %175 {offsets = [0, 64], sizes = [4, 32], strides = [1, 1]} : vector<4x96xf32> to vector<4x32xf32>
    %184 = math.tanh %182 : vector<4x32xf32>
    %185 = arith.mulf %183, %184 : vector<4x32xf32>
    %186 = arith.truncf %185 : vector<4x32xf32> to vector<4x32xbf16>
    %187 = vector.extract_strided_slice %186 {offsets = [0, 0], sizes = [2, 32], strides = [1, 1]} : vector<4x32xbf16> to vector<2x32xbf16>
    %188 = arith.index_cast %c2_i32_71 : i32 to index
    %c0_78 = arith.constant 0 : index
    %c0_79 = arith.constant 0 : index
    %189 = vector.load %arg11[%188, %c0_78, %c0_79] : memref<8x2x32xbf16, #tpu.memory_space<vmem>>, vector<1x2x32xbf16>
    %190 = vector.shape_cast %189 : vector<1x2x32xbf16> to vector<2x32xbf16>
    %191 = vector.shape_cast %187 : vector<2x32xbf16> to vector<1x2x32xbf16>
    tpu.vector_store %arg11[%188, %c0_78, %c0_79], %191 {strides = array<i32>} : memref<8x2x32xbf16, #tpu.memory_space<vmem>>, vector<1x2x32xbf16>,
    %192 = vector.extract_strided_slice %186 {offsets = [2, 0], sizes = [2, 32], strides = [1, 1]} : vector<4x32xbf16> to vector<2x32xbf16>
    %c7_i32_80 = arith.constant 7 : i32
    %193 = arith.subi %c7_i32_80, %c2_i32_71 : i32
    %194 = arith.index_cast %193 : i32 to index
    %c0_81 = arith.constant 0 : index
    %c0_82 = arith.constant 0 : index
    %195 = vector.load %arg12[%194, %c0_81, %c0_82] : memref<8x2x32xbf16, #tpu.memory_space<vmem>>, vector<1x2x32xbf16>
    %196 = vector.shape_cast %195 : vector<1x2x32xbf16> to vector<2x32xbf16>
    %197 = vector.shape_cast %192 : vector<2x32xbf16> to vector<1x2x32xbf16>
    tpu.vector_store %arg12[%194, %c0_81, %c0_82], %197 {strides = array<i32>} : memref<8x2x32xbf16, #tpu.memory_space<vmem>>, vector<1x2x32xbf16>,
    %cst_83 = arith.constant 0.000000e+00 : bf16
    %198 = vector.broadcast %cst_83 : bf16 to vector<4x32xbf16>
    %199 = vector.shape_cast %74 : vector<4x1xi1> to vector<4x1xi1>
    %200 = vector.broadcast %199 : vector<4x1xi1> to vector<4x32xi1>
    %201 = arith.select %200, %186, %198 : vector<4x32xi1>, vector<4x32xbf16>
    %202 = vector.shape_cast %74 : vector<4x1xi1> to vector<4x1xi1>
    %203 = vector.broadcast %202 : vector<4x1xi1> to vector<4x32xi1>
    %204 = arith.select %203, %198, %186 : vector<4x32xi1>, vector<4x32xbf16>
    %205 = tpu.concatenate %201, %204 in 1 : vector<4x32xbf16>, vector<4x32xbf16> -> vector<4x64xbf16>
    %c3_i32 = arith.constant 3 : i32
    %c0_84 = arith.constant 0 : index
    %c0_85 = arith.constant 0 : index
    %206 = vector.load %arg2[%c0_84, %c0_85] : memref<64x128xbf16, #tpu.memory_space<vmem>>, vector<64x128xbf16>
    %cst_86 = arith.constant dense<0.000000e+00> : vector<4x128xf32>
    %207 = tpu.matmul %205, %206, %cst_86 {dimension_numbers = #tpu.dot_dimension_numbers<[1], [0], [0], [1], [0, 0, 1, 1], [], []>} : vector<4x64xbf16>, vector<64x128xbf16>, vector<4x128xf32> -> vector<4x128xf32>
    %208 = arith.index_cast %c3_i32 : i32 to index
    %c0_87 = arith.constant 0 : index
    %c0_88 = arith.constant 0 : index
    %209 = vector.load %arg10[%208, %c0_87, %c0_88] : memref<8x4x128xbf16, #tpu.memory_space<vmem>>, vector<1x4x128xbf16>
    %210 = vector.shape_cast %209 : vector<1x4x128xbf16> to vector<4x128xbf16>
    %211 = arith.extf %210 : vector<4x128xbf16> to vector<4x128xf32>
    %212 = arith.addf %207, %211 : vector<4x128xf32>
    %213 = vector.extract_strided_slice %212 {offsets = [0, 0], sizes = [4, 96], strides = [1, 1]} : vector<4x128xf32> to vector<4x96xf32>
    %214 = arith.negf %213 : vector<4x96xf32>
    %215 = math.exp %214 : vector<4x96xf32>
    %cst_89 = arith.constant 1.000000e+00 : f32
    %216 = vector.broadcast %cst_89 : f32 to vector<4x96xf32>
    %217 = arith.addf %216, %215 : vector<4x96xf32>
    %218 = arith.divf %216, %217 : vector<4x96xf32>
    %219 = vector.extract_strided_slice %212 {offsets = [0, 96], sizes = [4, 32], strides = [1, 1]} : vector<4x128xf32> to vector<4x32xf32>
    %220 = math.tanh %219 : vector<4x32xf32>
    %221 = vector.extract_strided_slice %218 {offsets = [0, 32], sizes = [4, 32], strides = [1, 1]} : vector<4x96xf32> to vector<4x32xf32>
    %222 = arith.mulf %221, %182 : vector<4x32xf32>
    %223 = vector.extract_strided_slice %218 {offsets = [0, 0], sizes = [4, 32], strides = [1, 1]} : vector<4x96xf32> to vector<4x32xf32>
    %224 = arith.mulf %223, %220 : vector<4x32xf32>
    %225 = arith.addf %222, %224 : vector<4x32xf32>
    %226 = vector.extract_strided_slice %218 {offsets = [0, 64], sizes = [4, 32], strides = [1, 1]} : vector<4x96xf32> to vector<4x32xf32>
    %227 = math.tanh %225 : vector<4x32xf32>
    %228 = arith.mulf %226, %227 : vector<4x32xf32>
    %229 = arith.truncf %228 : vector<4x32xf32> to vector<4x32xbf16>
    %230 = vector.extract_strided_slice %229 {offsets = [0, 0], sizes = [2, 32], strides = [1, 1]} : vector<4x32xbf16> to vector<2x32xbf16>
    %231 = arith.index_cast %c3_i32 : i32 to index
    %c0_90 = arith.constant 0 : index
    %c0_91 = arith.constant 0 : index
    %232 = vector.load %arg11[%231, %c0_90, %c0_91] : memref<8x2x32xbf16, #tpu.memory_space<vmem>>, vector<1x2x32xbf16>
    %233 = vector.shape_cast %232 : vector<1x2x32xbf16> to vector<2x32xbf16>
    %234 = vector.shape_cast %230 : vector<2x32xbf16> to vector<1x2x32xbf16>
    tpu.vector_store %arg11[%231, %c0_90, %c0_91], %234 {strides = array<i32>} : memref<8x2x32xbf16, #tpu.memory_space<vmem>>, vector<1x2x32xbf16>,
    %235 = vector.extract_strided_slice %229 {offsets = [2, 0], sizes = [2, 32], strides = [1, 1]} : vector<4x32xbf16> to vector<2x32xbf16>
    %c7_i32_92 = arith.constant 7 : i32
    %236 = arith.subi %c7_i32_92, %c3_i32 : i32
    %237 = arith.index_cast %236 : i32 to index
    %c0_93 = arith.constant 0 : index
    %c0_94 = arith.constant 0 : index
    %238 = vector.load %arg12[%237, %c0_93, %c0_94] : memref<8x2x32xbf16, #tpu.memory_space<vmem>>, vector<1x2x32xbf16>
    %239 = vector.shape_cast %238 : vector<1x2x32xbf16> to vector<2x32xbf16>
    %240 = vector.shape_cast %235 : vector<2x32xbf16> to vector<1x2x32xbf16>
    tpu.vector_store %arg12[%237, %c0_93, %c0_94], %240 {strides = array<i32>} : memref<8x2x32xbf16, #tpu.memory_space<vmem>>, vector<1x2x32xbf16>,
    %cst_95 = arith.constant 0.000000e+00 : bf16
    %241 = vector.broadcast %cst_95 : bf16 to vector<4x32xbf16>
    %242 = vector.shape_cast %74 : vector<4x1xi1> to vector<4x1xi1>
    %243 = vector.broadcast %242 : vector<4x1xi1> to vector<4x32xi1>
    %244 = arith.select %243, %229, %241 : vector<4x32xi1>, vector<4x32xbf16>
    %245 = vector.shape_cast %74 : vector<4x1xi1> to vector<4x1xi1>
    %246 = vector.broadcast %245 : vector<4x1xi1> to vector<4x32xi1>
    %247 = arith.select %246, %241, %229 : vector<4x32xi1>, vector<4x32xbf16>
    %248 = tpu.concatenate %244, %247 in 1 : vector<4x32xbf16>, vector<4x32xbf16> -> vector<4x64xbf16>
    %c4_i32 = arith.constant 4 : i32
    %c0_96 = arith.constant 0 : index
    %c0_97 = arith.constant 0 : index
    %249 = vector.load %arg2[%c0_96, %c0_97] : memref<64x128xbf16, #tpu.memory_space<vmem>>, vector<64x128xbf16>
    %cst_98 = arith.constant dense<0.000000e+00> : vector<4x128xf32>
    %250 = tpu.matmul %248, %249, %cst_98 {dimension_numbers = #tpu.dot_dimension_numbers<[1], [0], [0], [1], [0, 0, 1, 1], [], []>} : vector<4x64xbf16>, vector<64x128xbf16>, vector<4x128xf32> -> vector<4x128xf32>
    %251 = arith.index_cast %c4_i32 : i32 to index
    %c0_99 = arith.constant 0 : index
    %c0_100 = arith.constant 0 : index
    %252 = vector.load %arg10[%251, %c0_99, %c0_100] : memref<8x4x128xbf16, #tpu.memory_space<vmem>>, vector<1x4x128xbf16>
    %253 = vector.shape_cast %252 : vector<1x4x128xbf16> to vector<4x128xbf16>
    %254 = arith.extf %253 : vector<4x128xbf16> to vector<4x128xf32>
    %255 = arith.addf %250, %254 : vector<4x128xf32>
    %256 = vector.extract_strided_slice %255 {offsets = [0, 0], sizes = [4, 96], strides = [1, 1]} : vector<4x128xf32> to vector<4x96xf32>
    %257 = arith.negf %256 : vector<4x96xf32>
    %258 = math.exp %257 : vector<4x96xf32>
    %cst_101 = arith.constant 1.000000e+00 : f32
    %259 = vector.broadcast %cst_101 : f32 to vector<4x96xf32>
    %260 = arith.addf %259, %258 : vector<4x96xf32>
    %261 = arith.divf %259, %260 : vector<4x96xf32>
    %262 = vector.extract_strided_slice %255 {offsets = [0, 96], sizes = [4, 32], strides = [1, 1]} : vector<4x128xf32> to vector<4x32xf32>
    %263 = math.tanh %262 : vector<4x32xf32>
    %264 = vector.extract_strided_slice %261 {offsets = [0, 32], sizes = [4, 32], strides = [1, 1]} : vector<4x96xf32> to vector<4x32xf32>
    %265 = arith.mulf %264, %225 : vector<4x32xf32>
    %266 = vector.extract_strided_slice %261 {offsets = [0, 0], sizes = [4, 32], strides = [1, 1]} : vector<4x96xf32> to vector<4x32xf32>
    %267 = arith.mulf %266, %263 : vector<4x32xf32>
    %268 = arith.addf %265, %267 : vector<4x32xf32>
    %269 = vector.extract_strided_slice %261 {offsets = [0, 64], sizes = [4, 32], strides = [1, 1]} : vector<4x96xf32> to vector<4x32xf32>
    %270 = math.tanh %268 : vector<4x32xf32>
    %271 = arith.mulf %269, %270 : vector<4x32xf32>
    %272 = arith.truncf %271 : vector<4x32xf32> to vector<4x32xbf16>
    %273 = vector.extract_strided_slice %272 {offsets = [0, 0], sizes = [2, 32], strides = [1, 1]} : vector<4x32xbf16> to vector<2x32xbf16>
    %274 = arith.index_cast %c4_i32 : i32 to index
    %c0_102 = arith.constant 0 : index
    %c0_103 = arith.constant 0 : index
    %275 = vector.load %arg11[%274, %c0_102, %c0_103] : memref<8x2x32xbf16, #tpu.memory_space<vmem>>, vector<1x2x32xbf16>
    %276 = vector.shape_cast %275 : vector<1x2x32xbf16> to vector<2x32xbf16>
    %277 = vector.shape_cast %273 : vector<2x32xbf16> to vector<1x2x32xbf16>
    tpu.vector_store %arg11[%274, %c0_102, %c0_103], %277 {strides = array<i32>} : memref<8x2x32xbf16, #tpu.memory_space<vmem>>, vector<1x2x32xbf16>,
    %278 = vector.extract_strided_slice %272 {offsets = [2, 0], sizes = [2, 32], strides = [1, 1]} : vector<4x32xbf16> to vector<2x32xbf16>
    %c7_i32_104 = arith.constant 7 : i32
    %279 = arith.subi %c7_i32_104, %c4_i32 : i32
    %280 = arith.index_cast %279 : i32 to index
    %c0_105 = arith.constant 0 : index
    %c0_106 = arith.constant 0 : index
    %281 = vector.load %arg12[%280, %c0_105, %c0_106] : memref<8x2x32xbf16, #tpu.memory_space<vmem>>, vector<1x2x32xbf16>
    %282 = vector.shape_cast %281 : vector<1x2x32xbf16> to vector<2x32xbf16>
    %283 = vector.shape_cast %278 : vector<2x32xbf16> to vector<1x2x32xbf16>
    tpu.vector_store %arg12[%280, %c0_105, %c0_106], %283 {strides = array<i32>} : memref<8x2x32xbf16, #tpu.memory_space<vmem>>, vector<1x2x32xbf16>,
    %cst_107 = arith.constant 0.000000e+00 : bf16
    %284 = vector.broadcast %cst_107 : bf16 to vector<4x32xbf16>
    %285 = vector.shape_cast %74 : vector<4x1xi1> to vector<4x1xi1>
    %286 = vector.broadcast %285 : vector<4x1xi1> to vector<4x32xi1>
    %287 = arith.select %286, %272, %284 : vector<4x32xi1>, vector<4x32xbf16>
    %288 = vector.shape_cast %74 : vector<4x1xi1> to vector<4x1xi1>
    %289 = vector.broadcast %288 : vector<4x1xi1> to vector<4x32xi1>
    %290 = arith.select %289, %284, %272 : vector<4x32xi1>, vector<4x32xbf16>
    %291 = tpu.concatenate %287, %290 in 1 : vector<4x32xbf16>, vector<4x32xbf16> -> vector<4x64xbf16>
    %c5_i32 = arith.constant 5 : i32
    %c0_108 = arith.constant 0 : index
    %c0_109 = arith.constant 0 : index
    %292 = vector.load %arg2[%c0_108, %c0_109] : memref<64x128xbf16, #tpu.memory_space<vmem>>, vector<64x128xbf16>
    %cst_110 = arith.constant dense<0.000000e+00> : vector<4x128xf32>
    %293 = tpu.matmul %291, %292, %cst_110 {dimension_numbers = #tpu.dot_dimension_numbers<[1], [0], [0], [1], [0, 0, 1, 1], [], []>} : vector<4x64xbf16>, vector<64x128xbf16>, vector<4x128xf32> -> vector<4x128xf32>
    %294 = arith.index_cast %c5_i32 : i32 to index
    %c0_111 = arith.constant 0 : index
    %c0_112 = arith.constant 0 : index
    %295 = vector.load %arg10[%294, %c0_111, %c0_112] : memref<8x4x128xbf16, #tpu.memory_space<vmem>>, vector<1x4x128xbf16>
    %296 = vector.shape_cast %295 : vector<1x4x128xbf16> to vector<4x128xbf16>
    %297 = arith.extf %296 : vector<4x128xbf16> to vector<4x128xf32>
    %298 = arith.addf %293, %297 : vector<4x128xf32>
    %299 = vector.extract_strided_slice %298 {offsets = [0, 0], sizes = [4, 96], strides = [1, 1]} : vector<4x128xf32> to vector<4x96xf32>
    %300 = arith.negf %299 : vector<4x96xf32>
    %301 = math.exp %300 : vector<4x96xf32>
    %cst_113 = arith.constant 1.000000e+00 : f32
    %302 = vector.broadcast %cst_113 : f32 to vector<4x96xf32>
    %303 = arith.addf %302, %301 : vector<4x96xf32>
    %304 = arith.divf %302, %303 : vector<4x96xf32>
    %305 = vector.extract_strided_slice %298 {offsets = [0, 96], sizes = [4, 32], strides = [1, 1]} : vector<4x128xf32> to vector<4x32xf32>
    %306 = math.tanh %305 : vector<4x32xf32>
    %307 = vector.extract_strided_slice %304 {offsets = [0, 32], sizes = [4, 32], strides = [1, 1]} : vector<4x96xf32> to vector<4x32xf32>
    %308 = arith.mulf %307, %268 : vector<4x32xf32>
    %309 = vector.extract_strided_slice %304 {offsets = [0, 0], sizes = [4, 32], strides = [1, 1]} : vector<4x96xf32> to vector<4x32xf32>
    %310 = arith.mulf %309, %306 : vector<4x32xf32>
    %311 = arith.addf %308, %310 : vector<4x32xf32>
    %312 = vector.extract_strided_slice %304 {offsets = [0, 64], sizes = [4, 32], strides = [1, 1]} : vector<4x96xf32> to vector<4x32xf32>
    %313 = math.tanh %311 : vector<4x32xf32>
    %314 = arith.mulf %312, %313 : vector<4x32xf32>
    %315 = arith.truncf %314 : vector<4x32xf32> to vector<4x32xbf16>
    %316 = vector.extract_strided_slice %315 {offsets = [0, 0], sizes = [2, 32], strides = [1, 1]} : vector<4x32xbf16> to vector<2x32xbf16>
    %317 = arith.index_cast %c5_i32 : i32 to index
    %c0_114 = arith.constant 0 : index
    %c0_115 = arith.constant 0 : index
    %318 = vector.load %arg11[%317, %c0_114, %c0_115] : memref<8x2x32xbf16, #tpu.memory_space<vmem>>, vector<1x2x32xbf16>
    %319 = vector.shape_cast %318 : vector<1x2x32xbf16> to vector<2x32xbf16>
    %320 = vector.shape_cast %316 : vector<2x32xbf16> to vector<1x2x32xbf16>
    tpu.vector_store %arg11[%317, %c0_114, %c0_115], %320 {strides = array<i32>} : memref<8x2x32xbf16, #tpu.memory_space<vmem>>, vector<1x2x32xbf16>,
    %321 = vector.extract_strided_slice %315 {offsets = [2, 0], sizes = [2, 32], strides = [1, 1]} : vector<4x32xbf16> to vector<2x32xbf16>
    %c7_i32_116 = arith.constant 7 : i32
    %322 = arith.subi %c7_i32_116, %c5_i32 : i32
    %323 = arith.index_cast %322 : i32 to index
    %c0_117 = arith.constant 0 : index
    %c0_118 = arith.constant 0 : index
    %324 = vector.load %arg12[%323, %c0_117, %c0_118] : memref<8x2x32xbf16, #tpu.memory_space<vmem>>, vector<1x2x32xbf16>
    %325 = vector.shape_cast %324 : vector<1x2x32xbf16> to vector<2x32xbf16>
    %326 = vector.shape_cast %321 : vector<2x32xbf16> to vector<1x2x32xbf16>
    tpu.vector_store %arg12[%323, %c0_117, %c0_118], %326 {strides = array<i32>} : memref<8x2x32xbf16, #tpu.memory_space<vmem>>, vector<1x2x32xbf16>,
    %cst_119 = arith.constant 0.000000e+00 : bf16
    %327 = vector.broadcast %cst_119 : bf16 to vector<4x32xbf16>
    %328 = vector.shape_cast %74 : vector<4x1xi1> to vector<4x1xi1>
    %329 = vector.broadcast %328 : vector<4x1xi1> to vector<4x32xi1>
    %330 = arith.select %329, %315, %327 : vector<4x32xi1>, vector<4x32xbf16>
    %331 = vector.shape_cast %74 : vector<4x1xi1> to vector<4x1xi1>
    %332 = vector.broadcast %331 : vector<4x1xi1> to vector<4x32xi1>
    %333 = arith.select %332, %327, %315 : vector<4x32xi1>, vector<4x32xbf16>
    %334 = tpu.concatenate %330, %333 in 1 : vector<4x32xbf16>, vector<4x32xbf16> -> vector<4x64xbf16>
    %c6_i32 = arith.constant 6 : i32
    %c0_120 = arith.constant 0 : index
    %c0_121 = arith.constant 0 : index
    %335 = vector.load %arg2[%c0_120, %c0_121] : memref<64x128xbf16, #tpu.memory_space<vmem>>, vector<64x128xbf16>
    %cst_122 = arith.constant dense<0.000000e+00> : vector<4x128xf32>
    %336 = tpu.matmul %334, %335, %cst_122 {dimension_numbers = #tpu.dot_dimension_numbers<[1], [0], [0], [1], [0, 0, 1, 1], [], []>} : vector<4x64xbf16>, vector<64x128xbf16>, vector<4x128xf32> -> vector<4x128xf32>
    %337 = arith.index_cast %c6_i32 : i32 to index
    %c0_123 = arith.constant 0 : index
    %c0_124 = arith.constant 0 : index
    %338 = vector.load %arg10[%337, %c0_123, %c0_124] : memref<8x4x128xbf16, #tpu.memory_space<vmem>>, vector<1x4x128xbf16>
    %339 = vector.shape_cast %338 : vector<1x4x128xbf16> to vector<4x128xbf16>
    %340 = arith.extf %339 : vector<4x128xbf16> to vector<4x128xf32>
    %341 = arith.addf %336, %340 : vector<4x128xf32>
    %342 = vector.extract_strided_slice %341 {offsets = [0, 0], sizes = [4, 96], strides = [1, 1]} : vector<4x128xf32> to vector<4x96xf32>
    %343 = arith.negf %342 : vector<4x96xf32>
    %344 = math.exp %343 : vector<4x96xf32>
    %cst_125 = arith.constant 1.000000e+00 : f32
    %345 = vector.broadcast %cst_125 : f32 to vector<4x96xf32>
    %346 = arith.addf %345, %344 : vector<4x96xf32>
    %347 = arith.divf %345, %346 : vector<4x96xf32>
    %348 = vector.extract_strided_slice %341 {offsets = [0, 96], sizes = [4, 32], strides = [1, 1]} : vector<4x128xf32> to vector<4x32xf32>
    %349 = math.tanh %348 : vector<4x32xf32>
    %350 = vector.extract_strided_slice %347 {offsets = [0, 32], sizes = [4, 32], strides = [1, 1]} : vector<4x96xf32> to vector<4x32xf32>
    %351 = arith.mulf %350, %311 : vector<4x32xf32>
    %352 = vector.extract_strided_slice %347 {offsets = [0, 0], sizes = [4, 32], strides = [1, 1]} : vector<4x96xf32> to vector<4x32xf32>
    %353 = arith.mulf %352, %349 : vector<4x32xf32>
    %354 = arith.addf %351, %353 : vector<4x32xf32>
    %355 = vector.extract_strided_slice %347 {offsets = [0, 64], sizes = [4, 32], strides = [1, 1]} : vector<4x96xf32> to vector<4x32xf32>
    %356 = math.tanh %354 : vector<4x32xf32>
    %357 = arith.mulf %355, %356 : vector<4x32xf32>
    %358 = arith.truncf %357 : vector<4x32xf32> to vector<4x32xbf16>
    %359 = vector.extract_strided_slice %358 {offsets = [0, 0], sizes = [2, 32], strides = [1, 1]} : vector<4x32xbf16> to vector<2x32xbf16>
    %360 = arith.index_cast %c6_i32 : i32 to index
    %c0_126 = arith.constant 0 : index
    %c0_127 = arith.constant 0 : index
    %361 = vector.load %arg11[%360, %c0_126, %c0_127] : memref<8x2x32xbf16, #tpu.memory_space<vmem>>, vector<1x2x32xbf16>
    %362 = vector.shape_cast %361 : vector<1x2x32xbf16> to vector<2x32xbf16>
    %363 = vector.shape_cast %359 : vector<2x32xbf16> to vector<1x2x32xbf16>
    tpu.vector_store %arg11[%360, %c0_126, %c0_127], %363 {strides = array<i32>} : memref<8x2x32xbf16, #tpu.memory_space<vmem>>, vector<1x2x32xbf16>,
    %364 = vector.extract_strided_slice %358 {offsets = [2, 0], sizes = [2, 32], strides = [1, 1]} : vector<4x32xbf16> to vector<2x32xbf16>
    %c7_i32_128 = arith.constant 7 : i32
    %365 = arith.subi %c7_i32_128, %c6_i32 : i32
    %366 = arith.index_cast %365 : i32 to index
    %c0_129 = arith.constant 0 : index
    %c0_130 = arith.constant 0 : index
    %367 = vector.load %arg12[%366, %c0_129, %c0_130] : memref<8x2x32xbf16, #tpu.memory_space<vmem>>, vector<1x2x32xbf16>
    %368 = vector.shape_cast %367 : vector<1x2x32xbf16> to vector<2x32xbf16>
    %369 = vector.shape_cast %364 : vector<2x32xbf16> to vector<1x2x32xbf16>
    tpu.vector_store %arg12[%366, %c0_129, %c0_130], %369 {strides = array<i32>} : memref<8x2x32xbf16, #tpu.memory_space<vmem>>, vector<1x2x32xbf16>,
    %cst_131 = arith.constant 0.000000e+00 : bf16
    %370 = vector.broadcast %cst_131 : bf16 to vector<4x32xbf16>
    %371 = vector.shape_cast %74 : vector<4x1xi1> to vector<4x1xi1>
    %372 = vector.broadcast %371 : vector<4x1xi1> to vector<4x32xi1>
    %373 = arith.select %372, %358, %370 : vector<4x32xi1>, vector<4x32xbf16>
    %374 = vector.shape_cast %74 : vector<4x1xi1> to vector<4x1xi1>
    %375 = vector.broadcast %374 : vector<4x1xi1> to vector<4x32xi1>
    %376 = arith.select %375, %370, %358 : vector<4x32xi1>, vector<4x32xbf16>
    %377 = tpu.concatenate %373, %376 in 1 : vector<4x32xbf16>, vector<4x32xbf16> -> vector<4x64xbf16>
    %c7_i32_132 = arith.constant 7 : i32
    %c0_133 = arith.constant 0 : index
    %c0_134 = arith.constant 0 : index
    %378 = vector.load %arg2[%c0_133, %c0_134] : memref<64x128xbf16, #tpu.memory_space<vmem>>, vector<64x128xbf16>
    %cst_135 = arith.constant dense<0.000000e+00> : vector<4x128xf32>
    %379 = tpu.matmul %377, %378, %cst_135 {dimension_numbers = #tpu.dot_dimension_numbers<[1], [0], [0], [1], [0, 0, 1, 1], [], []>} : vector<4x64xbf16>, vector<64x128xbf16>, vector<4x128xf32> -> vector<4x128xf32>
    %380 = arith.index_cast %c7_i32_132 : i32 to index
    %c0_136 = arith.constant 0 : index
    %c0_137 = arith.constant 0 : index
    %381 = vector.load %arg10[%380, %c0_136, %c0_137] : memref<8x4x128xbf16, #tpu.memory_space<vmem>>, vector<1x4x128xbf16>
    %382 = vector.shape_cast %381 : vector<1x4x128xbf16> to vector<4x128xbf16>
    %383 = arith.extf %382 : vector<4x128xbf16> to vector<4x128xf32>
    %384 = arith.addf %379, %383 : vector<4x128xf32>
    %385 = vector.extract_strided_slice %384 {offsets = [0, 0], sizes = [4, 96], strides = [1, 1]} : vector<4x128xf32> to vector<4x96xf32>
    %386 = arith.negf %385 : vector<4x96xf32>
    %387 = math.exp %386 : vector<4x96xf32>
    %cst_138 = arith.constant 1.000000e+00 : f32
    %388 = vector.broadcast %cst_138 : f32 to vector<4x96xf32>
    %389 = arith.addf %388, %387 : vector<4x96xf32>
    %390 = arith.divf %388, %389 : vector<4x96xf32>
    %391 = vector.extract_strided_slice %384 {offsets = [0, 96], sizes = [4, 32], strides = [1, 1]} : vector<4x128xf32> to vector<4x32xf32>
    %392 = math.tanh %391 : vector<4x32xf32>
    %393 = vector.extract_strided_slice %390 {offsets = [0, 32], sizes = [4, 32], strides = [1, 1]} : vector<4x96xf32> to vector<4x32xf32>
    %394 = arith.mulf %393, %354 : vector<4x32xf32>
    %395 = vector.extract_strided_slice %390 {offsets = [0, 0], sizes = [4, 32], strides = [1, 1]} : vector<4x96xf32> to vector<4x32xf32>
    %396 = arith.mulf %395, %392 : vector<4x32xf32>
    %397 = arith.addf %394, %396 : vector<4x32xf32>
    %398 = vector.extract_strided_slice %390 {offsets = [0, 64], sizes = [4, 32], strides = [1, 1]} : vector<4x96xf32> to vector<4x32xf32>
    %399 = math.tanh %397 : vector<4x32xf32>
    %400 = arith.mulf %398, %399 : vector<4x32xf32>
    %401 = arith.truncf %400 : vector<4x32xf32> to vector<4x32xbf16>
    %402 = vector.extract_strided_slice %401 {offsets = [0, 0], sizes = [2, 32], strides = [1, 1]} : vector<4x32xbf16> to vector<2x32xbf16>
    %403 = arith.index_cast %c7_i32_132 : i32 to index
    %c0_139 = arith.constant 0 : index
    %c0_140 = arith.constant 0 : index
    %404 = vector.load %arg11[%403, %c0_139, %c0_140] : memref<8x2x32xbf16, #tpu.memory_space<vmem>>, vector<1x2x32xbf16>
    %405 = vector.shape_cast %404 : vector<1x2x32xbf16> to vector<2x32xbf16>
    %406 = vector.shape_cast %402 : vector<2x32xbf16> to vector<1x2x32xbf16>
    tpu.vector_store %arg11[%403, %c0_139, %c0_140], %406 {strides = array<i32>} : memref<8x2x32xbf16, #tpu.memory_space<vmem>>, vector<1x2x32xbf16>,
    %407 = vector.extract_strided_slice %401 {offsets = [2, 0], sizes = [2, 32], strides = [1, 1]} : vector<4x32xbf16> to vector<2x32xbf16>
    %c7_i32_141 = arith.constant 7 : i32
    %408 = arith.subi %c7_i32_141, %c7_i32_132 : i32
    %409 = arith.index_cast %408 : i32 to index
    %c0_142 = arith.constant 0 : index
    %c0_143 = arith.constant 0 : index
    %410 = vector.load %arg12[%409, %c0_142, %c0_143] : memref<8x2x32xbf16, #tpu.memory_space<vmem>>, vector<1x2x32xbf16>
    %411 = vector.shape_cast %410 : vector<1x2x32xbf16> to vector<2x32xbf16>
    %412 = vector.shape_cast %407 : vector<2x32xbf16> to vector<1x2x32xbf16>
    tpu.vector_store %arg12[%409, %c0_142, %c0_143], %412 {strides = array<i32>} : memref<8x2x32xbf16, #tpu.memory_space<vmem>>, vector<1x2x32xbf16>,
    %cst_144 = arith.constant 0.000000e+00 : bf16
    %413 = vector.broadcast %cst_144 : bf16 to vector<4x32xbf16>
    %414 = vector.shape_cast %74 : vector<4x1xi1> to vector<4x1xi1>
    %415 = vector.broadcast %414 : vector<4x1xi1> to vector<4x32xi1>
    %416 = arith.select %415, %401, %413 : vector<4x32xi1>, vector<4x32xbf16>
    %417 = vector.shape_cast %74 : vector<4x1xi1> to vector<4x1xi1>
    %418 = vector.broadcast %417 : vector<4x1xi1> to vector<4x32xi1>
    %419 = arith.select %418, %413, %401 : vector<4x32xi1>, vector<4x32xbf16>
    %420 = tpu.concatenate %416, %419 in 1 : vector<4x32xbf16>, vector<4x32xbf16> -> vector<4x64xbf16>
    %c8_i32 = arith.constant 8 : i32
    %c0_145 = arith.constant 0 : index
    %c0_146 = arith.constant 0 : index
    %c0_147 = arith.constant 0 : index
    %421 = vector.load %arg11[%c0_145, %c0_146, %c0_147] : memref<8x2x32xbf16, #tpu.memory_space<vmem>>, vector<8x2x32xbf16>
    %422 = vector.shape_cast %421 : vector<8x2x32xbf16> to vector<16x32xbf16>
    %c0_148 = arith.constant 0 : index
    %c0_149 = arith.constant 0 : index
    %c0_150 = arith.constant 0 : index
    %423 = vector.load %arg12[%c0_148, %c0_149, %c0_150] : memref<8x2x32xbf16, #tpu.memory_space<vmem>>, vector<8x2x32xbf16>
    %424 = vector.shape_cast %423 : vector<8x2x32xbf16> to vector<16x32xbf16>
    %c0_151 = arith.constant 0 : index
    %c0_152 = arith.constant 0 : index
    %425 = vector.load %arg4[%c0_151, %c0_152] : memref<32x128xbf16, #tpu.memory_space<vmem>>, vector<32x128xbf16>
    %cst_153 = arith.constant dense<0.000000e+00> : vector<16x128xf32>
    %426 = tpu.matmul %422, %425, %cst_153 {dimension_numbers = #tpu.dot_dimension_numbers<[1], [0], [0], [1], [0, 0, 1, 1], [], []>} : vector<16x32xbf16>, vector<32x128xbf16>, vector<16x128xf32> -> vector<16x128xf32>
    %c0_154 = arith.constant 0 : index
    %c0_155 = arith.constant 0 : index
    %427 = vector.load %arg5[%c0_154, %c0_155] : memref<32x128xbf16, #tpu.memory_space<vmem>>, vector<32x128xbf16>
    %cst_156 = arith.constant dense<0.000000e+00> : vector<16x128xf32>
    %428 = tpu.matmul %424, %427, %cst_156 {dimension_numbers = #tpu.dot_dimension_numbers<[1], [0], [0], [1], [0, 0, 1, 1], [], []>} : vector<16x32xbf16>, vector<32x128xbf16>, vector<16x128xf32> -> vector<16x128xf32>
    %429 = arith.addf %426, %428 : vector<16x128xf32>
    %c0_157 = arith.constant 0 : index
    %c0_158 = arith.constant 0 : index
    %430 = vector.load %arg6[%c0_157, %c0_158] : memref<1x128xf32, #tpu.memory_space<vmem>>, vector<1x128xf32>
    %431 = vector.broadcast %430 : vector<1x128xf32> to vector<16x128xf32>
    %432 = arith.addf %429, %431 : vector<16x128xf32>
    %cst_159 = arith.constant 0.000000e+00 : f32
    %433 = vector.broadcast %cst_159 : f32 to vector<16x128xf32>
    %434 = arith.maximumf %432, %433 : vector<16x128xf32>
    %435 = arith.truncf %434 : vector<16x128xf32> to vector<16x128xbf16>
    %c0_160 = arith.constant 0 : index
    %c0_161 = arith.constant 0 : index
    %436 = vector.load %arg7[%c0_160, %c0_161] : memref<128x32xbf16, #tpu.memory_space<vmem>>, vector<128x32xbf16>
    %cst_162 = arith.constant dense<0.000000e+00> : vector<16x32xf32>
    %437 = tpu.matmul %435, %436, %cst_162 {dimension_numbers = #tpu.dot_dimension_numbers<[1], [0], [0], [1], [0, 0, 1, 1], [], []>} : vector<16x128xbf16>, vector<128x32xbf16>, vector<16x32xf32> -> vector<16x32xf32>
    %c0_163 = arith.constant 0 : index
    %c0_164 = arith.constant 0 : index
    %438 = vector.load %arg8[%c0_163, %c0_164] : memref<1x32xf32, #tpu.memory_space<vmem>>, vector<1x32xf32>
    %439 = vector.broadcast %438 : vector<1x32xf32> to vector<16x32xf32>
    %440 = arith.addf %437, %439 : vector<16x32xf32>
    %c0_165 = arith.constant 0 : index
    %c0_166 = arith.constant 0 : index
    %441 = vector.load %arg0[%c0_165, %c0_166] : memref<16x32xf32, #tpu.memory_space<vmem>>, vector<16x32xf32>
    %442 = arith.addf %441, %440 : vector<16x32xf32>
    %c0_167 = arith.constant 0 : index
    %c0_168 = arith.constant 0 : index
    %443 = vector.load %arg9[%c0_167, %c0_168] : memref<16x32xf32, #tpu.memory_space<vmem>>, vector<16x32xf32>
    tpu.vector_store %arg9[%c0_167, %c0_168], %442 {strides = array<i32>} : memref<16x32xf32, #tpu.memory_space<vmem>>, vector<16x32xf32>,
    return
  }
}

</mosaic_0001>

<bundles_post_ra>
// kernel: _forward.1
= control target key start
LH: loop header
LB: loop body
LE: loop exit
PB: predicated region body
PF: predicated region fallthrough
CT: control target
= control target key end

     0   :  { %14 = vsyncpa [#allocation6], 0  ;;  %s2170_s30 = smov [#allocation5]   ;;  %s2671_s0 = inlined_call_operand.vmem [shape: f32[16,32], index: 0, kind: input, shape index: {}, may-alias: {0,9}]   ;;  %s2672_s1 = inlined_call_operand.vmem [shape: bf16[32,256], index: 1, kind: input, shape index: {}]   ;;  %s2673_s2 = inlined_call_operand.vmem [shape: bf16[64,128], index: 2, kind: input, shape index: {}]   ;;  %s2674_s3 = inlined_call_operand.vmem [shape: f32[1,256], index: 3, kind: input, shape index: {}]   ;;  %s2675_s4 = inlined_call_operand.vmem [shape: bf16[32,128], index: 4, kind: input, shape index: {}]   ;;  %s2676_s5 = inlined_call_operand.hbm [shape: bf16[32,128], index: 5, kind: input, shape index: {}]   ;;  %s2677_s6 = inlined_call_operand.vmem [shape: f32[1,128], index: 6, kind: input, shape index: {}]   ;;  %s2678_s7 = inlined_call_operand.vmem [shape: bf16[128,32], index: 7, kind: input, shape index: {}]   ;;  %s2679_s8 = inlined_call_operand.vmem [shape: f32[1,32], index: 8, kind: input, shape index: {}]   ;;  %s2680_s9 = inlined_call_operand.vmem [shape: f32[16,32], index: 9, kind: output, shape index: {}, may-alias: {0,9}]  }
   0x1   :  { %s30_s10 = sshll.u32 %s2170_s30, 4  ;;  %s31_s10 = int_to_ptr.vmem [resolvable:$true] %s30_s10 }
   0x2   :  { %s2156_s11 = scalar_lea.vmem %s31_s10, 256  ;;  %p2161_p1 = scmp.lt.s32.totalorder %s31_s10, %s31_s10 }
   0x3   :  { %p2157_p0 = scmp.ne.s32.totalorder %s31_s10, %s2156_s11  ;;  %p2162_p2 = scmp.lt.s32.totalorder %s2156_s11, %s2156_s11 }
   0x5   :  { %p2163_p3 = por %p2162_p2, %p2161_p1 }
   0x7   :  { %p2164_p4 = pnand %p2163_p3, %p2157_p0 }
   0x9   :  { %2167 = shalt.err (!%p2164_p4)
}
   0xa   :  { %s2171_s12 = smov 64   ;;  %s2172_s13 = smov 4  }
   0xb   :  { %36 = dma.hbm_to_vmem [thread:$0]  %s2676_s5, 256, %s31_s10, [#allocation6], %s2171_s12, %s2171_s12, %s2172_s13  }
   0xc   :  { %2168 = dma.done.wait [#allocation6], 256  }
   0xd   :  { %2169 = vsyncadd [#allocation6], 4294967040  ;;  %v2173_v0 = vmov 0   ;;  %v2174_v1 = vmov 0.0   ;;  %vm2175_vm0 = vmmov 0   ;;  %v47_v6 = vld [vmem:[%s2671_s0] sm:$0xff]  ;;  %v56_v13 = vlaneseq }
   0xe   :  { %122 = vmatprep.mubr.bf16.mxu0 %v2173_v0  ;;  %1916 = vmatprep.subr.bf16.mxu1 %v2174_v1  ;;  %v2034_v2 = vld [vmem:[%s2672_s1 + $0x14] ss:$8 sps:$4 sm:$0xff]   ;;  %v2036_v3 = vld [vmem:[%s2672_s1 + $0x10] ss:$8 sps:$4 sm:$0xff]   ;;  %v2037_v4 = vld [vmem:[%s2672_s1 + $0x4] ss:$8 sps:$4 sm:$0xff]  }
   0xf   :  { %1924 = vmatprep.mubr.msk.bf16.mxu1 %vm2175_vm0, %v2174_v1  ;;  %102 = vmatprep.subr.bf16.mxu0 %v2034_v2  ;;  %v2039_v5 = vld [vmem:[%s2672_s1] ss:$8 sps:$4 sm:$0xff]   ;;  %vm86_vm1 = vcmask 261120   ;;  %v2040_v9 = vld [vmem:[%s2673_s2 + $0x18] sm:$0xff]   ;;  %v2041_v10 = vld [vmem:[%s2673_s2 + $0x10] sm:$0xff]   ;;  %v2278_v14 = vshrl.u32 %v56_v13, 7 }
  0x10   :  { %103 = vmatpush1.bf16.msra.mxu0 %v2036_v3  ;;  %v48_v7 = vld [vmem:[%s2671_s0 + $0x8] sm:$0xff]  ;;  %v2043_v12 = vld [vmem:[%s2673_s2] sm:$0xff]   ;;  %v2176_v16 = vmov 1983009808   ;;  %s2178_s23 = smov 96   ;;  %vm257_vm4 = vcmask 523264  }
  0x11   :  { %104 = vmatprep.subr.bf16.mxu0 %v2037_v4  ;;  %v49_v8 = vpack.c.bf16 %v48_v7, %v47_v6  ;;  %v2042_v11 = vld [vmem:[%s2673_s2 + $0x8] sm:$0xff]   ;;  %v58_v15 = vsub.s32 0, %v2278_v14  ;;  %v138_v17 = vunpack.c.l.s4 %v2176_v16  ;;  %v54_v18 = vld [vmem:[%s2674_s3] sm:$0x3]  ;;  %v62_v19 = vsub.s32 1, %v2278_v14  ;;  %s2177_s3 = smov 32  }
  0x12   :  { %v2044_v6 = vld [vmem:[%s2673_s2 + $0x18] sm:$0xff]   ;;  %v2045_v7 = vld [vmem:[%s2673_s2 + $0x10] sm:$0xff]   ;;  %vm222_vm2 = vcmp.lt.s32.totalorder %v2278_v14, 2  ;;  %vm344_vm5 = vcmask 253952  }
  0x13   :  { %v59_v21 = vrot.slane %v54_v18, %v58_v15  ;;  %v139_v22 = vunpack.c.0.s8 %v138_v17  ;;  %v63_v24 = vrot.slane %v54_v18, %v62_v19  ;;  %vm2306_vm3 = vmpackc.low %vm222_vm2, %vm222_vm2 }
  0x14   :  { %105 = vmatpush1.bf16.msra.mxu0 %v2039_v5 }
  0x15   :  { %1892 = vmatprep.subr.bf16.mxu0 %v2174_v1  ;;  %v142_v28 = vsub.s32 %v139_v22, %v2278_v14 }
  0x17   :  { %1765 = vmatmul.mubr.msk.bf16.vlgmr.msra.gmra.mxu0 %vm86_vm1, %v49_v8  ;;  %v2046_v8 = vld [vmem:[%s2673_s2 + $0x8] sm:$0xff]  }
  0x18   :  { %1893 = vmatpush3.bf16.msra.mxu0 %v2040_v9  ;;  %1900 = vmatprep.mubr.msk.bf16.mxu0 %vm2175_vm0, %v2174_v1 }
  0x19   :  { %1894 = vmatprep.subr.bf16.mxu0 %v2174_v1 }
  0x1c   :  { %1895 = vmatpush3.bf16.msra.mxu0 %v2041_v10  ;;  %v2047_v10 = vld [vmem:[%s2673_s2] sm:$0xff]  }
  0x1d   :  { %1896 = vmatprep.subr.bf16.mxu0 %v2174_v1 }
  0x20   :  { %1897 = vmatpush3.bf16.msra.mxu0 %v2042_v11 }
  0x21   :  { %1898 = vmatprep.subr.bf16.mxu0 %v2174_v1 }
  0x24   :  { %1899 = vmatpush3.bf16.msra.mxu0 %v2043_v12 }
  0x25   :  { %1904 = vmatprep.subr.bf16.mxu0 %v2174_v1 }
  0x27   :  { %1901 = vmatmul.mubr.bf16.vlgmr.msra.gmra.mxu0 %v2173_v0 }
  0x28   :  { %1912 = vmatprep.mubr.msk.bf16.mxu0 %vm2175_vm0, %v2174_v1  ;;  %1905 = vmatpush3.bf16.msra.mxu0 %v2044_v6  ;;  %v2053_v6 = vld [vmem:[%s2673_s2 + $0x10] sm:$0xff]  }
  0x29   :  { %1906 = vmatprep.subr.bf16.mxu0 %v2174_v1 }
  0x2c   :  { %1907 = vmatpush3.bf16.msra.mxu0 %v2045_v7  ;;  %v2054_v7 = vld [vmem:[%s2673_s2 + $0x8] sm:$0xff]  }
  0x2d   :  { %1908 = vmatprep.subr.bf16.mxu0 %v2174_v1 }
  0x30   :  { %1909 = vmatpush3.bf16.msra.mxu0 %v2046_v8 }
  0x31   :  { %1910 = vmatprep.subr.bf16.mxu0 %v2174_v1 }
  0x34   :  { %1911 = vmatpush3.bf16.msra.mxu0 %v2047_v10 }
  0x35   :  { %1928 = vmatprep.subr.bf16.mxu0 %v2174_v1 }
  0xd7   :  { %v124_v20 = vpop.f32.mrf.mxu0 }
  0xd8   :  { %v125_v26 = vadd.f32 %v124_v20, %v59_v21 }
  0xd9   :  { %v126_v23 = vpop.f32.mrf.mxu0 }
  0xda   :  { %v127_v30 = vadd.f32 %v126_v23, %v63_v24 }
  0xdb   :  { %v128_v25 = vpop.f32.mrf.mxu0 }
  0xdc   :  { %v129_v27 = vadd.f32 %v128_v25, %v59_v21 }
  0xdd   :  { %v130_v29 = vpop.f32.mrf.mxu0 }
  0xde   :  { %v133_v31 = vpack.c.bf16 %v129_v27, %v125_v26  ;;  %v1768_v32 = vpack.c.bf16 %v129_v27, %v129_v27  ;;  %v131_v33 = vadd.f32 %v130_v29, %v63_v24 }
  0xe0   :  { %135 = vst [vmem:[#allocation2] sm:$0x1] %v133_v31  ;;  %v155_v34 = vrot.slane %v133_v31, %v142_v28  ;;  %v187_v35 = vrot.slane %v1768_v32, %v142_v28  ;;  %1769 = vst.sshfl [vmem:[#allocation2 + $0x8] sm:$0x1 pattern:$0x76325410] %v1768_v32  ;;  %v134_v36 = vpack.c.bf16 %v131_v33, %v127_v30 }
  0xe1   :  { %v1770_v37 = vpack.c.bf16 %v131_v33, %v131_v33 }
  0xe2   :  { %v1766_v38 = vrot.slane %v155_v34, 9  ;;  %v163_v39 = vcombine.high %v155_v34, %v155_v34  ;;  %v1771_v40 = vrot.slane %v187_v35, 9  ;;  %v207_v41 = vcombine.high %v187_v35, %v187_v35  ;;  %162 = vst [vmem:[#allocation2 + $0xc] sm:$0x2] %v134_v36 }
  0xe3   :  { %1772 = vst.sshfl [vmem:[#allocation2 + $0x4] sm:$0x2 pattern:$0x76325410] %v1770_v37  ;;  %v143_v42 = vrot.slane %v134_v36, %v142_v28  ;;  %v197_v43 = vrot.slane %v1770_v37, %v142_v28 }
  0xe4   :  { %160 = vst [vmem:[#allocation2 + $0x2] sm:$0x1] %v1766_v38  ;;  %166 = vst [vmem:[#allocation2 + $0x4] sm:$0x1] %v163_v39  ;;  %v1767_v44 = vrot.slane %v163_v39, 9  ;;  %v1773_v45 = vrot.slane %v207_v41, 9 }
  0xe5   :  { %204 = vst [vmem:[#allocation2 + $0xa] sm:$0x1] %v1771_v40  ;;  %209 = vst [vmem:[#allocation2 + $0xc] sm:$0x1] %v207_v41  ;;  %v144_v46 = vrot.slane %v143_v42, 7  ;;  %v167_v47 = vcombine.high %v143_v42, %v143_v42  ;;  %v198_v48 = vrot.slane %v197_v43, 7  ;;  %v210_v49 = vcombine.high %v197_v43, %v197_v43 }
  0xe6   :  { %176 = vst [vmem:[#allocation2 + $0x6] sm:$0x1] %v1767_v44  ;;  %217 = vst [vmem:[#allocation2 + $0xe] sm:$0x1] %v1773_v45  ;;  %v2048_v38 = vld [vmem:[%s2673_s2 + $0x18] sm:$0xff]   ;;  %v2049_v39 = vld [vmem:[%s2673_s2 + $0x10] sm:$0xff]  }
  0xe7   :  { %147 = vst [vmem:[#allocation2 + $0xe] sm:$0x2] %v144_v46  ;;  %v168_v50 = vrot.slane %v167_v47, 7  ;;  %179 = vst [vmem:[#allocation2 + $0x8] sm:$0x2] %v167_v47  ;;  %v211_v51 = vrot.slane %v210_v49, 7  ;;  %v295_v52 = vpop.f32.mrf.mxu0  ;;  %1917 = vmatpush3.bf16.msra.mxu1 %v2048_v38 }
  0xe8   :  { %200 = vst [vmem:[#allocation2 + $0x6] sm:$0x2] %v198_v48  ;;  %219 = vst [vmem:[#allocation2] sm:$0x2] %v210_v49  ;;  %1918 = vmatprep.subr.bf16.mxu1 %v2174_v1  ;;  %v2050_v40 = vld [vmem:[%s2673_s2 + $0x8] sm:$0xff]   ;;  %v2051_v42 = vld [vmem:[%s2673_s2] sm:$0xff]  }
  0xe9   :  { %171 = vst [vmem:[#allocation2 + $0xa] sm:$0x2] %v168_v50  ;;  %213 = vst [vmem:[#allocation2 + $0x2] sm:$0x2] %v211_v51  ;;  %v1902_v53 = vpop.f32.mrf.mxu0  ;;  %v2056_v38 = vld [vmem:[%s2673_s2 + $0x18] sm:$0xff]  }
  0xeb   :  { %v298_v54 = vpop.f32.mrf.mxu0  ;;  %1919 = vmatpush3.bf16.msra.mxu1 %v2049_v39  ;;  %v526_v51 = vld [vmem:[#allocation2 + $0x4] sm:$0x3]  ;;  %v2057_v39 = vld [vmem:[%s2673_s2 + $0x10] sm:$0xff]  }
  0xec   :  { %1920 = vmatprep.subr.bf16.mxu1 %v2174_v1 }
  0xed   :  { %v1903_v55 = vpop.f32.mrf.mxu0 }
  0xef   :  { %v231_v56 = vld [vmem:[#allocation2] sm:$0x3]  ;;  %1921 = vmatpush3.bf16.msra.mxu1 %v2050_v40  ;;  %v2058_v40 = vld [vmem:[%s2673_s2 + $0x8] sm:$0xff]  }
  0xf0   :  { %v232_v57 = vunpack.c.l.bf16 %v231_v56  ;;  %v381_v21 = vld [vmem:[#allocation2 + $0x2] sm:$0x3]  ;;  %1922 = vmatprep.subr.bf16.mxu1 %v2174_v1 }
  0xf1   :  { %v382_v22 = vunpack.c.l.bf16 %v381_v21  ;;  %v671_v21 = vld [vmem:[#allocation2 + $0x6] sm:$0x3] }
  0xf2   :  { %v296_v58 = vadd.f32 %v295_v52, %v232_v57  ;;  %v527_v52 = vunpack.c.l.bf16 %v526_v51 }
  0xf3   :  { %1923 = vmatpush3.bf16.msra.mxu1 %v2051_v42  ;;  %v2059_v42 = vld [vmem:[%s2673_s2] sm:$0xff]  }
  0xf4   :  { %2084 = vtanh.f32 %v296_v58  ;;  %v1778_v60 = vmul.f32 -1.442695, %v296_v58  ;;  %1940 = vmatprep.subr.bf16.mxu1 %v2174_v1 }
  0xf6   :  { %2086 = vpow2.f32 %v1778_v60 }
 0x101   :  { %v2085_v59 = vpop.eup %2084 }
 0x102   :  { %310 = vrot.lane.b32.xlu0 %v2085_v59, %s2177_s3 }
 0x103   :  { %v2087_v61 = vpop.eup %2086 }
 0x104   :  { %v304_v62 = vadd.f32 1.0, %v2087_v61 }
 0x106   :  { %2088 = vrcp.f32 %v304_v62 }
 0x113   :  { %v2089_v63 = vpop.eup %2088 }
 0x114   :  { %v308_v3 = vmul.f32 0.0, %v2089_v63 }
 0x174   :  { %v311_v0 = vpop.permute.xlu0 %310 }
 0x175   :  { %v313_v2 = vmul.f32 %v2089_v63, %v311_v0 }
 0x177   :  { %315 = vrot.lane.b32.xlu0 %v313_v2, %s2177_s3 }
 0x1e9   :  { %v316_v4 = vpop.permute.xlu0 %315 }
 0x1ea   :  { %v318_v5 = vadd.f32 %v316_v4, %v308_v3 }
 0x1ec   :  { %2090 = vtanh.f32 %v318_v5 }
 0x1f9   :  { %v2091_v9 = vpop.eup %2090 }
 0x1fa   :  { %321 = vrot.lane.b32.xlu1 %v2091_v9, %s2177_s3  ;;  %v2055_v9 = vld [vmem:[%s2673_s2] sm:$0xff]  }
 0x26c   :  { %v322_v11 = vpop.permute.xlu1 %321 }
 0x26d   :  { %v324_v12 = vmul.f32 %v2089_v63, %v322_v11 }
 0x26f   :  { %v2310_v15 = vpack.c.bf16 %v324_v12, %v324_v12 }
 0x271   :  { %v363_v16 = vsel %vm2306_vm3, 0, %v2310_v15  ;;  %v362_v17 = vsel %vm2306_vm3, %v2310_v15, 0 }
 0x272   :  { %368 = vrot.lane.b32.xlu0 %v363_v16, %s2178_s23  ;;  %365 = vrot.lane.b32.xlu1 %v362_v17, %s2171_s12 }
 0x2e4   :  { %v369_v18 = vpop.permute.xlu0 %368  ;;  %v366_v19 = vpop.permute.xlu1 %365 }
 0x2e5   :  { %v372_v20 = vsel %vm86_vm1, %v366_v19, %v369_v18 }
 0x2e6   :  { %1913 = vmatmul.mubr.msk.bf16.vlgmr.msra.gmra.mxu0 %vm257_vm4, %v372_v20 }
 0x2e7   :  { %1936 = vmatprep.mubr.msk.bf16.mxu0 %vm2175_vm0, %v2174_v1 }
 0x3a6   :  { %v443_v23 = vpop.f32.mrf.mxu0 }
 0x3a7   :  { %v444_v24 = vadd.f32 %v443_v23, %v382_v22  ;;  %v672_v22 = vunpack.c.l.bf16 %v671_v21 }
 0x3a8   :  { %v1914_v25 = vpop.f32.mrf.mxu0 }
 0x3a9   :  { %2092 = vtanh.f32 %v444_v24  ;;  %v1784_v29 = vmul.f32 -1.442695, %v444_v24 }
 0x3aa   :  { %v446_v26 = vpop.f32.mrf.mxu0 }
 0x3ab   :  { %2094 = vpow2.f32 %v1784_v29 }
 0x3ac   :  { %v1915_v27 = vpop.f32.mrf.mxu0 }
 0x3b6   :  { %v2093_v28 = vpop.eup %2092 }
 0x3b7   :  { %458 = vrot.lane.b32.xlu1 %v2093_v28, %s2177_s3 }
 0x3b8   :  { %v2095_v30 = vpop.eup %2094 }
 0x3b9   :  { %v452_v31 = vadd.f32 1.0, %v2095_v30 }
 0x3bb   :  { %2096 = vrcp.f32 %v452_v31 }
 0x3c8   :  { %v2097_v32 = vpop.eup %2096 }
 0x3c9   :  { %v456_v35 = vmul.f32 %v2097_v32, %v318_v5  ;;  %v2052_v5 = vld [vmem:[%s2673_s2 + $0x18] sm:$0xff]  }
 0x3ca   :  { %1929 = vmatpush3.bf16.msra.mxu0 %v2052_v5 }
 0x3cb   :  { %1930 = vmatprep.subr.bf16.mxu0 %v2174_v1 }
 0x3ce   :  { %1931 = vmatpush3.bf16.msra.mxu0 %v2053_v6  ;;  %v2060_v6 = vld [vmem:[%s2673_s2 + $0x18] sm:$0xff]  }
 0x3cf   :  { %1932 = vmatprep.subr.bf16.mxu0 %v2174_v1 }
 0x3d2   :  { %1933 = vmatpush3.bf16.msra.mxu0 %v2054_v7  ;;  %v2061_v7 = vld [vmem:[%s2673_s2 + $0x10] sm:$0xff]  }
 0x3d3   :  { %1934 = vmatprep.subr.bf16.mxu0 %v2174_v1 }
 0x3d6   :  { %1935 = vmatpush3.bf16.msra.mxu0 %v2055_v9 }
 0x3d7   :  { %1952 = vmatprep.subr.bf16.mxu0 %v2174_v1 }
 0x429   :  { %v459_v33 = vpop.permute.xlu1 %458 }
 0x42a   :  { %v461_v34 = vmul.f32 %v2097_v32, %v459_v33 }
 0x42c   :  { %463 = vrot.lane.b32.xlu0 %v461_v34, %s2177_s3 }
 0x49e   :  { %v464_v36 = vpop.permute.xlu0 %463 }
 0x49f   :  { %v466_v37 = vadd.f32 %v464_v36, %v456_v35 }
 0x4a1   :  { %2098 = vtanh.f32 %v466_v37 }
 0x4ae   :  { %v2099_v41 = vpop.eup %2098 }
 0x4af   :  { %469 = vrot.lane.b32.xlu1 %v2099_v41, %s2177_s3 }
 0x521   :  { %v470_v43 = vpop.permute.xlu1 %469 }
 0x522   :  { %v472_v44 = vmul.f32 %v2097_v32, %v470_v43 }
 0x524   :  { %v2343_v45 = vpack.c.bf16 %v472_v44, %v472_v44 }
 0x526   :  { %v508_v46 = vsel %vm2306_vm3, 0, %v2343_v45  ;;  %v507_v47 = vsel %vm2306_vm3, %v2343_v45, 0 }
 0x527   :  { %513 = vrot.lane.b32.xlu1 %v508_v46, %s2178_s23  ;;  %510 = vrot.lane.b32.xlu0 %v507_v47, %s2171_s12 }
 0x599   :  { %v514_v48 = vpop.permute.xlu1 %513  ;;  %v511_v49 = vpop.permute.xlu0 %510 }
 0x59a   :  { %v517_v50 = vsel %vm86_vm1, %v511_v49, %v514_v48 }
 0x59b   :  { %1925 = vmatmul.mubr.msk.bf16.vlgmr.msra.gmra.mxu1 %vm257_vm4, %v517_v50 }
 0x59c   :  { %1948 = vmatprep.mubr.msk.bf16.mxu1 %vm2175_vm0, %v2174_v1  ;;  %1941 = vmatpush3.bf16.msra.mxu1 %v2056_v38 }
 0x59d   :  { %1942 = vmatprep.subr.bf16.mxu1 %v2174_v1 }
 0x5a0   :  { %1943 = vmatpush3.bf16.msra.mxu1 %v2057_v39 }
 0x5a1   :  { %1944 = vmatprep.subr.bf16.mxu1 %v2174_v1 }
 0x5a4   :  { %1945 = vmatpush3.bf16.msra.mxu1 %v2058_v40  ;;  %v2064_v40 = vld [vmem:[%s2673_s2 + $0x18] sm:$0xff]  }
 0x5a5   :  { %1946 = vmatprep.subr.bf16.mxu1 %v2174_v1 }
 0x5a8   :  { %1947 = vmatpush3.bf16.msra.mxu1 %v2059_v42  ;;  %v2066_v42 = vld [vmem:[%s2673_s2 + $0x8] sm:$0xff]  }
 0x5a9   :  { %1964 = vmatprep.subr.bf16.mxu1 %v2174_v1 }
 0x65b   :  { %v588_v53 = vpop.f32.mrf.mxu1 }
 0x65c   :  { %v589_v54 = vadd.f32 %v588_v53, %v527_v52  ;;  %v816_v52 = vld [vmem:[#allocation2 + $0x8] sm:$0x3] }
 0x65d   :  { %v1926_v55 = vpop.f32.mrf.mxu1  ;;  %v817_v53 = vunpack.c.l.bf16 %v816_v52 }
 0x65e   :  { %2100 = vtanh.f32 %v589_v54  ;;  %v1790_v59 = vmul.f32 -1.442695, %v589_v54 }
 0x65f   :  { %v591_v56 = vpop.f32.mrf.mxu1 }
 0x660   :  { %2102 = vpow2.f32 %v1790_v59 }
 0x661   :  { %v1927_v57 = vpop.f32.mrf.mxu1 }
 0x66b   :  { %v2101_v58 = vpop.eup %2100 }
 0x66c   :  { %603 = vrot.lane.b32.xlu0 %v2101_v58, %s2177_s3 }
 0x66d   :  { %v2103_v60 = vpop.eup %2102 }
 0x66e   :  { %v597_v61 = vadd.f32 1.0, %v2103_v60 }
 0x670   :  { %2104 = vrcp.f32 %v597_v61 }
 0x67d   :  { %v2105_v62 = vpop.eup %2104 }
 0x67e   :  { %v601_v2 = vmul.f32 %v2105_v62, %v466_v37 }
 0x6de   :  { %v604_v63 = vpop.permute.xlu0 %603 }
 0x6df   :  { %v606_v0 = vmul.f32 %v2105_v62, %v604_v63 }
 0x6e1   :  { %608 = vrot.lane.b32.xlu1 %v606_v0, %s2177_s3 }
 0x753   :  { %v609_v3 = vpop.permute.xlu1 %608 }
 0x754   :  { %v611_v4 = vadd.f32 %v609_v3, %v601_v2 }
 0x756   :  { %2106 = vtanh.f32 %v611_v4 }
 0x763   :  { %v2107_v8 = vpop.eup %2106 }
 0x764   :  { %614 = vrot.lane.b32.xlu0 %v2107_v8, %s2177_s3  ;;  %v2062_v8 = vld [vmem:[%s2673_s2 + $0x8] sm:$0xff]  }
 0x7d6   :  { %v615_v10 = vpop.permute.xlu0 %614 }
 0x7d7   :  { %v617_v11 = vmul.f32 %v2105_v62, %v615_v10  ;;  %v2063_v10 = vld [vmem:[%s2673_s2] sm:$0xff]  }
 0x7d9   :  { %v2376_v12 = vpack.c.bf16 %v617_v11, %v617_v11 }
 0x7db   :  { %v653_v16 = vsel %vm2306_vm3, 0, %v2376_v12  ;;  %v652_v17 = vsel %vm2306_vm3, %v2376_v12, 0 }
 0x7dc   :  { %658 = vrot.lane.b32.xlu0 %v653_v16, %s2178_s23  ;;  %655 = vrot.lane.b32.xlu1 %v652_v17, %s2171_s12 }
 0x84e   :  { %v659_v18 = vpop.permute.xlu0 %658  ;;  %v656_v19 = vpop.permute.xlu1 %655 }
 0x84f   :  { %v662_v20 = vsel %vm86_vm1, %v656_v19, %v659_v18 }
 0x850   :  { %1937 = vmatmul.mubr.msk.bf16.vlgmr.msra.gmra.mxu0 %vm257_vm4, %v662_v20 }
 0x851   :  { %1960 = vmatprep.mubr.msk.bf16.mxu0 %vm2175_vm0, %v2174_v1  ;;  %1953 = vmatpush3.bf16.msra.mxu0 %v2060_v6 }
 0x852   :  { %1954 = vmatprep.subr.bf16.mxu0 %v2174_v1 }
 0x855   :  { %1955 = vmatpush3.bf16.msra.mxu0 %v2061_v7 }
 0x856   :  { %1956 = vmatprep.subr.bf16.mxu0 %v2174_v1 }
 0x859   :  { %1957 = vmatpush3.bf16.msra.mxu0 %v2062_v8 }
 0x85a   :  { %1958 = vmatprep.subr.bf16.mxu0 %v2174_v1 }
 0x85d   :  { %1959 = vmatpush3.bf16.msra.mxu0 %v2063_v10  ;;  %v2069_v10 = vld [vmem:[%s2673_s2 + $0x10] sm:$0xff]  }
 0x85e   :  { %1976 = vmatprep.subr.bf16.mxu0 %v2174_v1 }
 0x910   :  { %v733_v23 = vpop.f32.mrf.mxu0 }
 0x911   :  { %v734_v24 = vadd.f32 %v733_v23, %v672_v22  ;;  %v961_v23 = vld [vmem:[#allocation2 + $0xa] sm:$0x3] }
 0x912   :  { %v1938_v25 = vpop.f32.mrf.mxu0 }
 0x913   :  { %2108 = vtanh.f32 %v734_v24  ;;  %v1796_v29 = vmul.f32 -1.442695, %v734_v24  ;;  %v962_v24 = vunpack.c.l.bf16 %v961_v23 }
 0x914   :  { %v736_v26 = vpop.f32.mrf.mxu0 }
 0x915   :  { %2110 = vpow2.f32 %v1796_v29 }
 0x916   :  { %v1939_v27 = vpop.f32.mrf.mxu0 }
 0x920   :  { %v2109_v28 = vpop.eup %2108 }
 0x921   :  { %748 = vrot.lane.b32.xlu1 %v2109_v28, %s2177_s3 }
 0x922   :  { %v2111_v30 = vpop.eup %2110 }
 0x923   :  { %v742_v31 = vadd.f32 1.0, %v2111_v30 }
 0x925   :  { %2112 = vrcp.f32 %v742_v31 }
 0x932   :  { %v2113_v32 = vpop.eup %2112 }
 0x933   :  { %v746_v35 = vmul.f32 %v2113_v32, %v611_v4 }
 0x993   :  { %v749_v33 = vpop.permute.xlu1 %748 }
 0x994   :  { %v751_v34 = vmul.f32 %v2113_v32, %v749_v33 }
 0x996   :  { %753 = vrot.lane.b32.xlu0 %v751_v34, %s2177_s3 }
 0xa08   :  { %v754_v36 = vpop.permute.xlu0 %753 }
 0xa09   :  { %v756_v37 = vadd.f32 %v754_v36, %v746_v35 }
 0xa0b   :  { %2114 = vtanh.f32 %v756_v37 }
 0xa18   :  { %v2115_v41 = vpop.eup %2114 }
 0xa19   :  { %759 = vrot.lane.b32.xlu1 %v2115_v41, %s2177_s3  ;;  %v2065_v41 = vld [vmem:[%s2673_s2 + $0x10] sm:$0xff]  }
 0xa8b   :  { %v760_v43 = vpop.permute.xlu1 %759 }
 0xa8c   :  { %v762_v44 = vmul.f32 %v2113_v32, %v760_v43 }
 0xa8e   :  { %v2409_v46 = vpack.c.bf16 %v762_v44, %v762_v44  ;;  %v2067_v44 = vld [vmem:[%s2673_s2] sm:$0xff]  }
 0xa90   :  { %v798_v47 = vsel %vm2306_vm3, 0, %v2409_v46  ;;  %v797_v48 = vsel %vm2306_vm3, %v2409_v46, 0 }
 0xa91   :  { %803 = vrot.lane.b32.xlu1 %v798_v47, %s2178_s23  ;;  %800 = vrot.lane.b32.xlu0 %v797_v48, %s2171_s12 }
 0xb03   :  { %v804_v49 = vpop.permute.xlu1 %803  ;;  %v801_v50 = vpop.permute.xlu0 %800 }
 0xb04   :  { %v807_v51 = vsel %vm86_vm1, %v801_v50, %v804_v49 }
 0xb05   :  { %1949 = vmatmul.mubr.msk.bf16.vlgmr.msra.gmra.mxu1 %vm257_vm4, %v807_v51 }
 0xb06   :  { %1972 = vmatprep.mubr.msk.bf16.mxu1 %vm2175_vm0, %v2174_v1  ;;  %1965 = vmatpush3.bf16.msra.mxu1 %v2064_v40 }
 0xb07   :  { %1966 = vmatprep.subr.bf16.mxu1 %v2174_v1 }
 0xb0a   :  { %1967 = vmatpush3.bf16.msra.mxu1 %v2065_v41 }
 0xb0b   :  { %1968 = vmatprep.subr.bf16.mxu1 %v2174_v1 }
 0xb0e   :  { %1969 = vmatpush3.bf16.msra.mxu1 %v2066_v42 }
 0xb0f   :  { %1970 = vmatprep.subr.bf16.mxu1 %v2174_v1 }
 0xb12   :  { %1971 = vmatpush3.bf16.msra.mxu1 %v2067_v44 }
 0xb13   :  { %1988 = vmatprep.subr.bf16.mxu1 %v2174_v1 }
 0xbc5   :  { %v878_v54 = vpop.f32.mrf.mxu1 }
 0xbc6   :  { %v879_v55 = vadd.f32 %v878_v54, %v817_v53 }
 0xbc7   :  { %v1950_v56 = vpop.f32.mrf.mxu1 }
 0xbc8   :  { %2116 = vtanh.f32 %v879_v55  ;;  %v1802_v60 = vmul.f32 -1.442695, %v879_v55  ;;  %v1106_v55 = vld [vmem:[#allocation2 + $0xc] sm:$0x3] }
 0xbc9   :  { %v881_v57 = vpop.f32.mrf.mxu1  ;;  %v1107_v56 = vunpack.c.l.bf16 %v1106_v55 }
 0xbca   :  { %2118 = vpow2.f32 %v1802_v60 }
 0xbcb   :  { %v1951_v58 = vpop.f32.mrf.mxu1 }
 0xbd5   :  { %v2117_v59 = vpop.eup %2116 }
 0xbd6   :  { %893 = vrot.lane.b32.xlu0 %v2117_v59, %s2177_s3 }
 0xbd7   :  { %v2119_v61 = vpop.eup %2118 }
 0xbd8   :  { %v887_v62 = vadd.f32 1.0, %v2119_v61 }
 0xbda   :  { %2120 = vrcp.f32 %v887_v62 }
 0xbe7   :  { %v2121_v63 = vpop.eup %2120 }
 0xbe8   :  { %v891_v3 = vmul.f32 %v2121_v63, %v756_v37 }
 0xc48   :  { %v894_v0 = vpop.permute.xlu0 %893 }
 0xc49   :  { %v896_v2 = vmul.f32 %v2121_v63, %v894_v0 }
 0xc4b   :  { %898 = vrot.lane.b32.xlu1 %v896_v2, %s2177_s3 }
 0xcbd   :  { %v899_v4 = vpop.permute.xlu1 %898 }
 0xcbe   :  { %v901_v5 = vadd.f32 %v899_v4, %v891_v3 }
 0xcc0   :  { %2122 = vtanh.f32 %v901_v5 }
 0xccd   :  { %v2123_v9 = vpop.eup %2122 }
 0xcce   :  { %904 = vrot.lane.b32.xlu0 %v2123_v9, %s2177_s3  ;;  %v2068_v9 = vld [vmem:[%s2673_s2 + $0x18] sm:$0xff]  }
 0xd40   :  { %v905_v11 = vpop.permute.xlu0 %904 }
 0xd41   :  { %v907_v16 = vmul.f32 %v2121_v63, %v905_v11  ;;  %v2070_v11 = vld [vmem:[%s2673_s2 + $0x8] sm:$0xff]  }
 0xd43   :  { %v2442_v17 = vpack.c.bf16 %v907_v16, %v907_v16 }
 0xd45   :  { %v943_v18 = vsel %vm2306_vm3, 0, %v2442_v17  ;;  %v942_v19 = vsel %vm2306_vm3, %v2442_v17, 0 }
 0xd46   :  { %948 = vrot.lane.b32.xlu0 %v943_v18, %s2178_s23  ;;  %945 = vrot.lane.b32.xlu1 %v942_v19, %s2171_s12  ;;  %v2071_v18 = vld [vmem:[%s2673_s2] sm:$0xff]  }
 0xdb8   :  { %v949_v20 = vpop.permute.xlu0 %948  ;;  %v946_v21 = vpop.permute.xlu1 %945 }
 0xdb9   :  { %v952_v22 = vsel %vm86_vm1, %v946_v21, %v949_v20 }
 0xdba   :  { %1961 = vmatmul.mubr.msk.bf16.vlgmr.msra.gmra.mxu0 %vm257_vm4, %v952_v22 }
 0xdbb   :  { %1984 = vmatprep.mubr.msk.bf16.mxu0 %vm2175_vm0, %v2174_v1  ;;  %1977 = vmatpush3.bf16.msra.mxu0 %v2068_v9 }
 0xdbc   :  { %1978 = vmatprep.subr.bf16.mxu0 %v2174_v1 }
 0xdbf   :  { %1979 = vmatpush3.bf16.msra.mxu0 %v2069_v10 }
 0xdc0   :  { %1980 = vmatprep.subr.bf16.mxu0 %v2174_v1 }
 0xdc3   :  { %1981 = vmatpush3.bf16.msra.mxu0 %v2070_v11 }
 0xdc4   :  { %1982 = vmatprep.subr.bf16.mxu0 %v2174_v1 }
 0xdc7   :  { %1983 = vmatpush3.bf16.msra.mxu0 %v2071_v18 }
 0xdc8   :  { %1996 = vmatprep.subr.bf16.mxu0 %v2174_v1 }
 0xe7a   :  { %v1023_v25 = vpop.f32.mrf.mxu0 }
 0xe7b   :  { %v1024_v26 = vadd.f32 %v1023_v25, %v962_v24 }
 0xe7c   :  { %v1962_v27 = vpop.f32.mrf.mxu0 }
 0xe7d   :  { %2124 = vtanh.f32 %v1024_v26  ;;  %v1808_v31 = vmul.f32 -1.442695, %v1024_v26  ;;  %v1251_v27 = vld [vmem:[#allocation2 + $0xe] sm:$0x3] }
 0xe7e   :  { %v1026_v28 = vpop.f32.mrf.mxu0 }
 0xe7f   :  { %2126 = vpow2.f32 %v1808_v31  ;;  %v1252_v28 = vunpack.c.l.bf16 %v1251_v27 }
 0xe80   :  { %v1963_v29 = vpop.f32.mrf.mxu0 }
 0xe8a   :  { %v2125_v30 = vpop.eup %2124 }
 0xe8b   :  { %1038 = vrot.lane.b32.xlu1 %v2125_v30, %s2177_s3 }
 0xe8c   :  { %v2127_v32 = vpop.eup %2126 }
 0xe8d   :  { %v1032_v33 = vadd.f32 1.0, %v2127_v32 }
 0xe8f   :  { %2128 = vrcp.f32 %v1032_v33 }
 0xe9c   :  { %v2129_v34 = vpop.eup %2128 }
 0xe9d   :  { %v1036_v37 = vmul.f32 %v2129_v34, %v901_v5 }
 0xefd   :  { %v1039_v35 = vpop.permute.xlu1 %1038 }
 0xefe   :  { %v1041_v36 = vmul.f32 %v2129_v34, %v1039_v35 }
 0xf00   :  { %1043 = vrot.lane.b32.xlu0 %v1041_v36, %s2177_s3 }
 0xf72   :  { %v1044_v38 = vpop.permute.xlu0 %1043 }
 0xf73   :  { %v1046_v39 = vadd.f32 %v1044_v38, %v1036_v37  ;;  %v2179_v37 = vmov 1966171168  }
 0xf74   :  { %v328_v38 = vunpack.c.l.s4 %v2179_v37 }
 0xf75   :  { %2130 = vtanh.f32 %v1046_v39 }
 0xf82   :  { %v2131_v43 = vpop.eup %2130 }
 0xf83   :  { %1049 = vrot.lane.b32.xlu1 %v2131_v43, %s2177_s3 }
 0xff5   :  { %v1050_v47 = vpop.permute.xlu1 %1049 }
 0xff6   :  { %v1052_v48 = vmul.f32 %v2129_v34, %v1050_v47 }
 0xff8   :  { %v2475_v49 = vpack.c.bf16 %v1052_v48, %v1052_v48 }
 0xffa   :  { %v1088_v50 = vsel %vm2306_vm3, 0, %v2475_v49  ;;  %v1087_v51 = vsel %vm2306_vm3, %v2475_v49, 0 }
 0xffb   :  { %1093 = vrot.lane.b32.xlu1 %v1088_v50, %s2178_s23  ;;  %1090 = vrot.lane.b32.xlu0 %v1087_v51, %s2171_s12 }
0x106d   :  { %v1094_v52 = vpop.permute.xlu1 %1093  ;;  %v1091_v53 = vpop.permute.xlu0 %1090 }
0x106e   :  { %v1097_v54 = vsel %vm86_vm1, %v1091_v53, %v1094_v52 }
0x106f   :  { %1973 = vmatmul.mubr.msk.bf16.vlgmr.msra.gmra.mxu1 %vm257_vm4, %v1097_v54 }
0x1070   :  { %1992 = vmatprep.mubr.msk.bf16.mxu1 %vm2175_vm0, %v2174_v1 }
0x112f   :  { %v1168_v57 = vpop.f32.mrf.mxu1 }
0x1130   :  { %v1169_v58 = vadd.f32 %v1168_v57, %v1107_v56 }
0x1131   :  { %v1974_v59 = vpop.f32.mrf.mxu1 }
0x1132   :  { %2132 = vtanh.f32 %v1169_v58  ;;  %v1814_v63 = vmul.f32 -1.442695, %v1169_v58 }
0x1133   :  { %v1171_v60 = vpop.f32.mrf.mxu1 }
0x1134   :  { %2134 = vpow2.f32 %v1814_v63 }
0x1135   :  { %v1975_v61 = vpop.f32.mrf.mxu1 }
0x113f   :  { %v2133_v62 = vpop.eup %2132 }
0x1140   :  { %1183 = vrot.lane.b32.xlu0 %v2133_v62, %s2177_s3 }
0x1141   :  { %v2135_v0 = vpop.eup %2134 }
0x1142   :  { %v1177_v2 = vadd.f32 1.0, %v2135_v0 }
0x1144   :  { %2136 = vrcp.f32 %v1177_v2 }
0x1151   :  { %v2137_v3 = vpop.eup %2136 }
0x1152   :  { %v1181_v6 = vmul.f32 %v2137_v3, %v1046_v39  ;;  %v329_v39 = vunpack.c.0.s8 %v328_v38 }
0x1154   :  { %v2523_v40 = vsub.s32 %v329_v39, %v2278_v14 }
0x1156   :  { %v333_v44 = vrot.slane %v2310_v15, %v2523_v40  ;;  %v481_v48 = vrot.slane %v2343_v45, %v2523_v40  ;;  %v626_v50 = vrot.slane %v2376_v12, %v2523_v40  ;;  %v771_v15 = vrot.slane %v2409_v46, %v2523_v40 }
0x1157   :  { %v916_v45 = vrot.slane %v2442_v17, %v2523_v40  ;;  %v1061_v12 = vrot.slane %v2475_v49, %v2523_v40 }
0x1158   :  { %v340_v47 = vrot.slane %v333_v44, %v2523_v40  ;;  %v488_v14 = vrot.slane %v481_v48, %v2523_v40  ;;  %v633_v51 = vrot.slane %v626_v50, %v2523_v40  ;;  %v778_v52 = vrot.slane %v771_v15, %v2523_v40 }
0x1159   :  { %v923_v53 = vrot.slane %v916_v45, %v2523_v40  ;;  %v1068_v54 = vrot.slane %v1061_v12, %v2523_v40  ;;  %v346_v60 = vcombine.high %v333_v44, %v333_v44  ;;  %v494_v0 = vcombine.high %v481_v48, %v481_v48 }
0x115a   :  { %v929_v10 = vcombine.high %v916_v45, %v916_v45 }
0x115b   :  { %v353_v63 = vrot.slane %v346_v60, %v2523_v40 }
0x115c   :  { %v936_v11 = vrot.slane %v929_v10, %v2523_v40 }
0x11b2   :  { %v1184_v4 = vpop.permute.xlu0 %1183 }
0x11b3   :  { %v1186_v5 = vmul.f32 %v2137_v3, %v1184_v4  ;;  %v639_v4 = vcombine.high %v626_v50, %v626_v50 }
0x11b5   :  { %1188 = vrot.lane.b32.xlu1 %v1186_v5, %s2177_s3 }
0x1227   :  { %v1189_v7 = vpop.permute.xlu1 %1188 }
0x1228   :  { %v2491_v8 = vadd.f32 %v1189_v7, %v1181_v6  ;;  %v646_v6 = vrot.slane %v639_v4, %v2523_v40  ;;  %v784_v7 = vcombine.high %v771_v15, %v771_v15 }
0x122a   :  { %2138 = vtanh.f32 %v2491_v8  ;;  %v791_v9 = vrot.slane %v784_v7, %v2523_v40 }
0x1237   :  { %v2139_v16 = vpop.eup %2138 }
0x1238   :  { %1194 = vrot.lane.b32.xlu0 %v2139_v16, %s2177_s3  ;;  %v1074_v16 = vcombine.high %v1061_v12, %v1061_v12 }
0x123a   :  { %v1081_v18 = vrot.slane %v1074_v16, %v2523_v40 }
0x12aa   :  { %v1195_v19 = vpop.permute.xlu0 %1194 }
0x12ab   :  { %v1197_v20 = vmul.f32 %v2137_v3, %v1195_v19  ;;  %v501_v3 = vrot.slane %v494_v0, %v2523_v40 }
0x12ad   :  { %v1198_v21 = vpack.c.bf16 %v1197_v20, %v1197_v20 }
0x12af   :  { %v1233_v22 = vsel %vm2306_vm3, 0, %v1198_v21  ;;  %v1232_v23 = vsel %vm2306_vm3, %v1198_v21, 0  ;;  %v1206_v46 = vrot.slane %v1198_v21, %v2523_v40  ;;  %v2072_v21 = vld [vmem:[%s2675_s4 + $0x8] sm:$0xff]  }
0x12b0   :  { %1238 = vrot.lane.b32.xlu0 %v1233_v22, %s2178_s23  ;;  %1235 = vrot.lane.b32.xlu1 %v1232_v23, %s2171_s12  ;;  %v2073_v22 = vld [vmem:[#allocation5 + $0x8] sm:$0xff]  }
0x12b1   :  { %v1213_v55 = vrot.slane %v1206_v46, %v2523_v40  ;;  %v1219_v19 = vcombine.high %v1206_v46, %v1206_v46  ;;  %1989 = vmatpush3.bf16.msra.mxu1 %v2073_v22  ;;  %v2077_v22 = vld [vmem:[%s2678_s7 + $0x30] sm:$0xff]  }
0x12b2   :  { %1990 = vmatprep.subr.bf16.mxu1 %v2174_v1 }
0x12b3   :  { %v1226_v20 = vrot.slane %v1219_v19, %v2523_v40 }
0x1322   :  { %v1239_v24 = vpop.permute.xlu0 %1238  ;;  %v1236_v25 = vpop.permute.xlu1 %1235 }
0x1323   :  { %v1242_v26 = vsel %vm86_vm1, %v1236_v25, %v1239_v24  ;;  %v2074_v24 = vld [vmem:[%s2675_s4] sm:$0xff]  }
0x1324   :  { %1985 = vmatmul.mubr.msk.bf16.vlgmr.msra.gmra.mxu0 %vm257_vm4, %v1242_v26  ;;  %v2075_v25 = vld [vmem:[#allocation5] sm:$0xff]  }
0x1325   :  { %2000 = vmatprep.mubr.msk.bf16.mxu0 %vm2175_vm0, %v2174_v1  ;;  %1997 = vmatpush3.bf16.msra.mxu0 %v2072_v21 }
0x1326   :  { %1998 = vmatprep.subr.bf16.mxu0 %v2174_v1  ;;  %1991 = vmatpush3.bf16.msra.mxu1 %v2075_v25  ;;  %v2081_v25 = vld [vmem:[%s2678_s7 + $0x10] sm:$0xff]  }
0x1327   :  { %2004 = vmatprep.subr.bf16.mxu1 %v2174_v1 }
0x1329   :  { %1999 = vmatpush3.bf16.msra.mxu0 %v2074_v24  ;;  %v2080_v24 = vld [vmem:[%s2678_s7 + $0x18] sm:$0xff]  }
0x13e4   :  { %v1313_v29 = vpop.f32.mrf.mxu0 }
0x13e5   :  { %v1314_v30 = vadd.f32 %v1313_v29, %v1252_v28 }
0x13e6   :  { %v1986_v31 = vpop.f32.mrf.mxu0 }
0x13e7   :  { %2140 = vtanh.f32 %v1314_v30  ;;  %v1820_v34 = vmul.f32 -1.442695, %v1314_v30 }
0x13e8   :  { %v1316_v13 = vpop.f32.mrf.mxu0 }
0x13e9   :  { %2142 = vpow2.f32 %v1820_v34 }
0x13ea   :  { %v1987_v32 = vpop.f32.mrf.mxu0 }
0x13f4   :  { %v2141_v33 = vpop.eup %2140 }
0x13f5   :  { %1328 = vrot.lane.b32.xlu1 %v2141_v33, %s2177_s3 }
0x13f6   :  { %v2143_v35 = vpop.eup %2142 }
0x13f7   :  { %v1322_v36 = vadd.f32 1.0, %v2143_v35 }
0x13f9   :  { %2144 = vrcp.f32 %v1322_v36 }
0x1406   :  { %v2525_v41 = vpop.eup %2144 }
0x1407   :  { %v1326_v17 = vmul.f32 %v2525_v41, %v2491_v8 }
0x1467   :  { %v1329_v42 = vpop.permute.xlu1 %1328 }
0x1468   :  { %v1331_v43 = vmul.f32 %v2525_v41, %v1329_v42 }
0x146a   :  { %1333 = vrot.lane.b32.xlu0 %v1331_v43, %s2177_s3 }
0x146e   :  { %341 = vrot.lane.b32.xlu0 %v340_v47, %s2171_s12 }
0x1472   :  { %489 = vrot.lane.b32.xlu0 %v488_v14, %s2171_s12 }
0x1476   :  { %634 = vrot.lane.b32.xlu0 %v633_v51, %s2171_s12 }
0x147a   :  { %779 = vrot.lane.b32.xlu0 %v778_v52, %s2171_s12 }
0x147e   :  { %924 = vrot.lane.b32.xlu0 %v923_v53, %s2171_s12 }
0x1482   :  { %1069 = vrot.lane.b32.xlu0 %v1068_v54, %s2171_s12 }
0x1486   :  { %1214 = vrot.lane.b32.xlu0 %v1213_v55, %s2171_s12 }
0x14dc   :  { %v1334_v56 = vpop.permute.xlu0 %1333 }
0x14dd   :  { %v1336_v57 = vadd.f32 %v1334_v56, %v1326_v17 }
0x14df   :  { %2146 = vtanh.f32 %v1336_v57 }
0x14e0   :  { %v342_v49 = vpop.permute.xlu0 %341 }
0x14e1   :  { %345 = vst.msk [vmem:[#allocation3] sm:$0x1] %vm344_vm5, %v342_v49 }
0x14e4   :  { %v490_v58 = vpop.permute.xlu0 %489 }
0x14e5   :  { %493 = vst.msk [vmem:[#allocation3 + $0x1] sm:$0x1] %vm344_vm5, %v490_v58 }
0x14e8   :  { %v635_v59 = vpop.permute.xlu0 %634  ;;  %v1376_v48 = vld [vmem:[#allocation3] sm:$0x1] }
0x14e9   :  { %638 = vst.msk [vmem:[#allocation3 + $0x2] sm:$0x1] %vm344_vm5, %v635_v59 }
0x14ec   :  { %v2147_v61 = vpop.eup %2146  ;;  %v780_v62 = vpop.permute.xlu0 %779 }
0x14ed   :  { %783 = vst.msk [vmem:[#allocation3 + $0x3] sm:$0x1] %vm344_vm5, %v780_v62  ;;  %1339 = vrot.lane.b32.xlu1 %v2147_v61, %s2177_s3 }
0x14f0   :  { %v925_v2 = vpop.permute.xlu0 %924  ;;  %v1378_v42 = vld [vmem:[#allocation3 + $0x2] sm:$0x1] }
0x14f1   :  { %928 = vst.msk [vmem:[#allocation3 + $0x4] sm:$0x1] %vm344_vm5, %v925_v2  ;;  %354 = vrot.lane.b32.xlu1 %v353_v63, %s2171_s12 }
0x14f4   :  { %v1070_v5 = vpop.permute.xlu0 %1069  ;;  %v1379_v38 = vld [vmem:[#allocation3 + $0x3] sm:$0x1] }
0x14f5   :  { %1073 = vst.msk [vmem:[#allocation3 + $0x5] sm:$0x1] %vm344_vm5, %v1070_v5  ;;  %502 = vrot.lane.b32.xlu1 %v501_v3, %s2171_s12  ;;  %v1522_v44 = vcombine.low %v1378_v42, %v1379_v38 }
0x14f7   :  { %v1538_v53 = vrot.slane %v1522_v44, %v2523_v40 }
0x14f8   :  { %v1215_v8 = vpop.permute.xlu0 %1214  ;;  %v1380_v45 = vld [vmem:[#allocation3 + $0x4] sm:$0x1] }
0x14f9   :  { %1218 = vst.msk [vmem:[#allocation3 + $0x6] sm:$0x1] %vm344_vm5, %v1215_v8  ;;  %647 = vrot.lane.b32.xlu1 %v646_v6, %s2171_s12 }
0x14fc   :  { %v1381_v14 = vld [vmem:[#allocation3 + $0x5] sm:$0x1] }
0x14fd   :  { %792 = vrot.lane.b32.xlu1 %v791_v9, %s2171_s12  ;;  %v1523_v46 = vcombine.low %v1380_v45, %v1381_v14 }
0x14ff   :  { %v1545_v0 = vrot.slane %v1523_v46, %v2523_v40 }
0x1500   :  { %v1382_v17 = vld [vmem:[#allocation3 + $0x6] sm:$0x1] }
0x1501   :  { %937 = vrot.lane.b32.xlu1 %v936_v11, %s2171_s12 }
0x1505   :  { %1082 = vrot.lane.b32.xlu1 %v1081_v18, %s2171_s12 }
0x1509   :  { %1227 = vrot.lane.b32.xlu1 %v1226_v20, %s2171_s12  ;;  %v2076_v20 = vld [vmem:[%s2678_s7 + $0x38] sm:$0xff]  }
0x155f   :  { %v1340_v23 = vpop.permute.xlu1 %1339 }
0x1560   :  { %v1342_v26 = vmul.f32 %v2525_v41, %v1340_v23  ;;  %v1377_v41 = vld [vmem:[#allocation3 + $0x1] sm:$0x1]  ;;  %v2079_v23 = vld [vmem:[%s2678_s7 + $0x20] sm:$0xff]  }
0x1561   :  { %v1521_v50 = vcombine.low %v1376_v48, %v1377_v41 }
0x1562   :  { %v1343_v27 = vpack.c.bf16 %v1342_v26, %v1342_v26  ;;  %v2082_v26 = vld [vmem:[%s2678_s7 + $0x8] sm:$0xff]  }
0x1563   :  { %v355_v28 = vpop.permute.xlu1 %354  ;;  %v1531_v57 = vrot.slane %v1521_v50, %v2523_v40 }
0x1564   :  { %v1351_v29 = vrot.slane %v1343_v27, %v2523_v40  ;;  %358 = vst.msk [vmem:[#allocation4 + $0x7] sm:$0x1] %vm344_vm5, %v355_v28  ;;  %v2083_v27 = vld [vmem:[%s2678_s7] sm:$0xff]  }
0x1565   :  { %v1553_v61 = vcombine.low %v1531_v57, %v1538_v53 }
0x1566   :  { %v1358_v30 = vrot.slane %v1351_v29, %v2523_v40  ;;  %v1364_v31 = vcombine.high %v1351_v29, %v1351_v29 }
0x1567   :  { %v503_v13 = vpop.permute.xlu1 %502  ;;  %v1561_v9 = vrot.slane %v1553_v61, %v2523_v40 }
0x1568   :  { %506 = vst.msk [vmem:[#allocation4 + $0x6] sm:$0x1] %vm344_vm5, %v503_v13  ;;  %1359 = vrot.lane.b32.xlu0 %v1358_v30, %s2171_s12  ;;  %v1371_v32 = vrot.slane %v1364_v31, %v2523_v40  ;;  %v1827_v13 = vld [vmem:[%s2677_s6] ss:$0 sm:$0xff] }
0x156a   :  { %1372 = vrot.lane.b32.xlu1 %v1371_v32, %s2171_s12 }
0x156b   :  { %v648_v33 = vpop.permute.xlu1 %647  ;;  %v1391_v54 = vld [vmem:[#allocation4 + $0x7] sm:$0x1] }
0x156c   :  { %651 = vst.msk [vmem:[#allocation4 + $0x5] sm:$0x1] %vm344_vm5, %v648_v33 }
0x156f   :  { %v793_v34 = vpop.permute.xlu1 %792  ;;  %v1390_v15 = vld [vmem:[#allocation4 + $0x6] sm:$0x1] }
0x1570   :  { %796 = vst.msk [vmem:[#allocation4 + $0x4] sm:$0x1] %vm344_vm5, %v793_v34  ;;  %v1411_v55 = vcombine.low %v1390_v15, %v1391_v54  ;;  %v1751_v15 = vld [vmem:[%s2671_s0 + $0x8] sm:$0xff] }
0x1572   :  { %v1439_v4 = vrot.slane %v1411_v55, %v2523_v40 }
0x1573   :  { %v938_v35 = vpop.permute.xlu1 %937  ;;  %v1389_v51 = vld [vmem:[#allocation4 + $0x5] sm:$0x1] }
0x1574   :  { %941 = vst.msk [vmem:[#allocation4 + $0x3] sm:$0x1] %vm344_vm5, %v938_v35 }
0x1577   :  { %v1083_v36 = vpop.permute.xlu1 %1082  ;;  %v1388_v47 = vld [vmem:[#allocation4 + $0x4] sm:$0x1] }
0x1578   :  { %1086 = vst.msk [vmem:[#allocation4 + $0x2] sm:$0x1] %vm344_vm5, %v1083_v36  ;;  %v1410_v52 = vcombine.low %v1388_v47, %v1389_v51  ;;  %v1750_v47 = vld [vmem:[%s2671_s0] sm:$0xff] }
0x157a   :  { %v1432_v60 = vrot.slane %v1410_v52, %v2523_v40 }
0x157b   :  { %v1228_v37 = vpop.permute.xlu1 %1227  ;;  %v1387_v49 = vld [vmem:[#allocation4 + $0x3] sm:$0x1] }
0x157c   :  { %1231 = vst.msk [vmem:[#allocation4 + $0x1] sm:$0x1] %vm344_vm5, %v1228_v37  ;;  %v1441_v8 = vcombine.low %v1432_v60, %v1439_v4 }
0x157e   :  { %v1455_v19 = vrot.slane %v1441_v8, %v2523_v40 }
0x157f   :  { %v1386_v12 = vld [vmem:[#allocation4 + $0x2] sm:$0x1] }
0x1580   :  { %v1409_v59 = vcombine.low %v1386_v12, %v1387_v49 }
0x1582   :  { %v1425_v7 = vrot.slane %v1409_v59, %v2523_v40 }
0x1583   :  { %v1385_v63 = vld [vmem:[#allocation4 + $0x1] sm:$0x1] }
0x15da   :  { %v1360_v39 = vpop.permute.xlu0 %1359 }
0x15db   :  { %1363 = vst.msk [vmem:[#allocation3 + $0x7] sm:$0x1] %vm344_vm5, %v1360_v39 }
0x15dc   :  { %v1373_v43 = vpop.permute.xlu1 %1372 }
0x15dd   :  { %1375 = vst.msk [vmem:[#allocation4] sm:$0x1] %vm344_vm5, %v1373_v43  ;;  %v1828_v43 = vld [vmem:[%s2679_s8] ss:$0 sm:$0xff] }
0x15e2   :  { %v1383_v56 = vld [vmem:[#allocation3 + $0x7] sm:$0x1] }
0x15e3   :  { %v1524_v58 = vcombine.low %v1382_v17, %v1383_v56 }
0x15e4   :  { %v1384_v62 = vld [vmem:[#allocation4] sm:$0x1] }
0x15e5   :  { %v1552_v2 = vrot.slane %v1524_v58, %v2523_v40  ;;  %v1408_v3 = vcombine.low %v1384_v62, %v1385_v63 }
0x15e7   :  { %v1554_v5 = vcombine.low %v1545_v0, %v1552_v2  ;;  %v1418_v6 = vrot.slane %v1408_v3, %v2523_v40 }
0x15e9   :  { %v1568_v10 = vrot.slane %v1554_v5, %v2523_v40  ;;  %v1440_v11 = vcombine.low %v1418_v6, %v1425_v7 }
0x15eb   :  { %v1569_v16 = vcombine.low %v1561_v9, %v1568_v10  ;;  %v1448_v18 = vrot.slane %v1440_v11, %v2523_v40  ;;  %v2078_v40 = vld [vmem:[%s2678_s7 + $0x28] sm:$0xff]  }
0x15ed   :  { %2001 = vmatmul.mubr.msk.bf16.vlgmr.msra.gmra.mxu0 %vm86_vm1, %v1569_v16  ;;  %v1456_v21 = vcombine.low %v1448_v18, %v1455_v19 }
0x15ef   :  { %1993 = vmatmul.mubr.msk.bf16.vlgmr.msra.gmra.mxu1 %vm86_vm1, %v1456_v21 }
0x15f0   :  { %2005 = vmatpush3.bf16.msra.mxu1 %v2076_v20  ;;  %2020 = vmatprep.mubr.msk.bf16.mxu1 %vm2175_vm0, %v2174_v1 }
0x15f1   :  { %2006 = vmatprep.subr.bf16.mxu1 %v2174_v1 }
0x15f4   :  { %2007 = vmatpush3.bf16.msra.mxu1 %v2077_v22 }
0x15f5   :  { %2008 = vmatprep.subr.bf16.mxu1 %v2174_v1 }
0x15f8   :  { %2009 = vmatpush3.bf16.msra.mxu1 %v2078_v40 }
0x15f9   :  { %2010 = vmatprep.subr.bf16.mxu1 %v2174_v1 }
0x15fc   :  { %2011 = vmatpush3.bf16.msra.mxu1 %v2079_v23 }
0x15fd   :  { %2012 = vmatprep.subr.bf16.mxu1 %v2174_v1 }
0x1600   :  { %2013 = vmatpush3.bf16.msra.mxu1 %v2080_v24 }
0x1601   :  { %2014 = vmatprep.subr.bf16.mxu1 %v2174_v1 }
0x1604   :  { %2015 = vmatpush3.bf16.msra.mxu1 %v2081_v25 }
0x1605   :  { %2016 = vmatprep.subr.bf16.mxu1 %v2174_v1 }
0x1608   :  { %2017 = vmatpush3.bf16.msra.mxu1 %v2082_v26 }
0x1609   :  { %2018 = vmatprep.subr.bf16.mxu1 %v2174_v1 }
0x160c   :  { %2019 = vmatpush3.bf16.msra.mxu1 %v2083_v27 }
0x16ad   :  { %v1619_v28 = vpop.f32.mrf.mxu0 }
0x16af   :  { %v1506_v29 = vpop.f32.mrf.mxu1  ;;  %v2002_v30 = vpop.f32.mrf.mxu0 }
0x16b0   :  { %v1620_v31 = vadd.f32 %v1619_v28, %v1506_v29 }
0x16b1   :  { %v1994_v32 = vpop.f32.mrf.mxu1  ;;  %v1622_v33 = vpop.f32.mrf.mxu0 }
0x16b2   :  { %v1633_v36 = vadd.f32 %v1827_v13, %v1620_v31 }
0x16b3   :  { %v1509_v34 = vpop.f32.mrf.mxu1  ;;  %v2003_v35 = vpop.f32.mrf.mxu0 }
0x16b4   :  { %v1623_v37 = vadd.f32 %v1622_v33, %v1509_v34  ;;  %v1635_v39 = vmax.f32 %v1633_v36, 0.0 }
0x16b5   :  { %v1995_v1 = vpop.f32.mrf.mxu1 }
0x16b6   :  { %v1634_v38 = vadd.f32 %v1827_v13, %v1623_v37 }
0x16b8   :  { %v1636_v41 = vmax.f32 %v1634_v38, 0.0 }
0x16ba   :  { %v1637_v42 = vpack.c.bf16 %v1636_v41, %v1635_v39 }
0x16bc   :  { %2021 = vmatmul.mubr.bf16.vlgmr.msra.gmra.mxu1 %v1637_v42 }
0x177c   :  { %v1743_v44 = vpop.f32.mrf.mxu1 }
0x177d   :  { %v1744_v48 = vadd.f32 %v1828_v43, %v1743_v44 }
0x177e   :  { %v2022_v14 = vpop.f32.mrf.mxu1 }
0x177f   :  { %v1752_v50 = vadd.f32 %v1750_v47, %v1744_v48 }
0x1780   :  { %v1746_v51 = vpop.f32.mrf.mxu1 }
0x1781   :  { %1754 = vst.msk [vmem:[%s2680_s9] sm:$0xff] %vm86_vm1, %v1752_v50  ;;  %v1747_v52 = vadd.f32 %v1828_v43, %v1746_v51 }
0x1782   :  { %v2023_v45 = vpop.f32.mrf.mxu1 }
0x1783   :  { %v1753_v53 = vadd.f32 %v1751_v15, %v1747_v52 }
0x1785   :  { %1755 = vst.msk [vmem:[%s2680_s9 + $0x8] sm:$0xff] %vm86_vm1, %v1753_v53 }
0x1786   :  { %1760 = vsyncpa [#allocation6], 1 }

</bundles_post_ra>
